<compile_context>
chip_gen: v5e
topology: v5e:2x2
jax: 0.10.0
libtpu: 0.0.40
codegen_flags: <defaults>
</compile_context>

<pallas_src>
import jax
import jax.numpy as jnp
from jax.experimental import pallas as pl
from jax.experimental.pallas import tpu as pltpu

_LANE = 128
_SUBLANE = 8
_VMEM_LIMIT = 32 * 1024 * 1024          # plenty for <2 MiB of resident state
_FUSED_WEIGHT_BUDGET = 24 * 1024 * 1024  # double-buffered weights must fit this


def _round_up(x, m):
    return (x + m - 1) // m * m


# ----------------------------------------------------------------------------
# Fused kernel: per batch row-tile
#   h1 = tanh(x  @ W1' + shift1)      (Linear + folded BN + Tanh; Dropout=id)
#   h2 = tanh(h1 @ W2' + shift2)
#   p  = softmax(h2 @ W3 + b3, dim=1) (padded class cols have b3 = -1e30 -> 0)
# All weights are full VMEM-resident blocks; grid iterates batch tiles only.
# ----------------------------------------------------------------------------
def _fused_mlp_kernel(x_ref, w1_ref, t1_ref, w2_ref, t2_ref, w3_ref, b3_ref,
                      o_ref):
    x = x_ref[...].astype(jnp.bfloat16)
    h = jnp.tanh(
        jnp.dot(x, w1_ref[...], preferred_element_type=jnp.float32)
        + t1_ref[...])
    h = jnp.tanh(
        jnp.dot(h.astype(jnp.bfloat16), w2_ref[...],
                preferred_element_type=jnp.float32)
        + t2_ref[...])
    z = jnp.dot(h.astype(jnp.bfloat16), w3_ref[...],
                preferred_element_type=jnp.float32) + b3_ref[...]
    # Numerically-stable softmax over the class axis (exact divide).
    z = z - jnp.max(z, axis=-1, keepdims=True)
    e = jnp.exp(z)
    o_ref[...] = (e / jnp.sum(e, axis=-1, keepdims=True)).astype(o_ref.dtype)


def fused_forward(x, params, num_classes):
    w1, t1 = params["w1"], params["t1"]
    w2, t2 = params["w2"], params["t2"]
    w3, b3 = params["w3"], params["b3"]
    kp, hp = w1.shape           # padded in_features, padded hidden
    cp = w3.shape[1]            # padded num_classes

    M, K = x.shape
    tm = min(128, _round_up(max(M, 1), _SUBLANE))
    mp = _round_up(M, tm)

    xp = x.astype(jnp.float32)
    if (mp, kp) != (M, K):      # no-op for aligned demo shapes
        xp = jnp.pad(xp, ((0, mp - M), (0, kp - K)))

    out = pl.pallas_call(
        _fused_mlp_kernel,
        out_shape=jax.ShapeDtypeStruct((mp, cp), jnp.float32),
        grid_spec=pltpu.PrefetchScalarGridSpec(
            num_scalar_prefetch=0,
            grid=(mp // tm,),
            in_specs=[
                pl.BlockSpec((tm, kp), lambda i: (i, 0)),   # x row panel
                pl.BlockSpec((kp, hp), lambda i: (0, 0)),   # W1' (BN folded) bf16
                pl.BlockSpec((1, hp), lambda i: (0, 0)),    # shift1
                pl.BlockSpec((hp, hp), lambda i: (0, 0)),   # W2' bf16
                pl.BlockSpec((1, hp), lambda i: (0, 0)),    # shift2
                pl.BlockSpec((hp, cp), lambda i: (0, 0)),   # W3 bf16
                pl.BlockSpec((1, cp), lambda i: (0, 0)),    # b3 (-1e30 in pad cols)
            ],
            out_specs=pl.BlockSpec((tm, cp), lambda i: (i, 0)),
        ),
        compiler_params=pltpu.CompilerParams(
            dimension_semantics=("parallel",),
            vmem_limit_bytes=_VMEM_LIMIT,
        ),
    )(xp, w1, t1, w2, t2, w3, b3)

    if (mp, cp) != (M, num_classes):
        out = out[:M, :num_classes]
    return out


# ----------------------------------------------------------------------------
# Parameters: PyTorch-style init, eval-mode BN folding, bf16 + pad prep.
# ----------------------------------------------------------------------------
def init_params(key, in_features, hidden, num_classes, dtype=jnp.float32):
    ks = jax.random.split(key, 16)

    def linear(kw, kb, fin, fout):
        bound = 1.0 / float(fin) ** 0.5
        w = jax.random.uniform(kw, (fin, fout), dtype, -bound, bound)  # [in, out]
        b = jax.random.uniform(kb, (fout,), dtype, -bound, bound)
        return w, b

    def batchnorm(kg, kb, km, kv, f):
        gamma = 1.0 + 0.1 * jax.random.normal(kg, (f,), dtype)
        beta = 0.1 * jax.random.normal(kb, (f,), dtype)
        mean = 0.1 * jax.random.normal(km, (f,), dtype)
        var = jnp.abs(jax.random.normal(kv, (f,), dtype)) + 0.5
        return gamma, beta, mean, var

    w1, b1 = linear(ks[0], ks[1], in_features, hidden)
    g1, be1, m1, v1 = batchnorm(ks[2], ks[3], ks[4], ks[5], hidden)
    w2, b2 = linear(ks[6], ks[7], hidden, hidden)
    g2, be2, m2, v2 = batchnorm(ks[8], ks[9], ks[10], ks[11], hidden)
    w3, b3 = linear(ks[12], ks[13], hidden, num_classes)
    return dict(w1=w1, b1=b1, g1=g1, be1=be1, m1=m1, v1=v1,
                w2=w2, b2=b2, g2=g2, be2=be2, m2=m2, v2=v2,
                w3=w3, b3=b3)


def _fold_bn(w, b, gamma, beta, mean, var, eps=1e-5):
    scale = gamma / jnp.sqrt(var + eps)
    return w * scale[None, :], b * scale + beta - mean * scale


def prepare_params(raw, eps=1e-5):
    """One-time prep (outside the forward): fold eval-mode BN into the linear
    weights, cast weights to bf16 and zero-pad feature dims to lane multiples.
    Padded hidden cols get shift 0 (tanh(0)=0, downstream rows are zero);
    padded class cols get bias -1e30 (softmax prob 0)."""
    in_f, hidden = raw["w1"].shape
    num_classes = raw["w3"].shape[1]
    kp = _round_up(in_f, _LANE)
    hp = _round_up(hidden, _LANE)
    cp = _round_up(num_classes, _LANE)

    w1f, t1 = _fold_bn(raw["w1"], raw["b1"], raw["g1"], raw["be1"],
                       raw["m1"], raw["v1"], eps)
    w2f, t2 = _fold_bn(raw["w2"], raw["b2"], raw["g2"], raw["be2"],
                       raw["m2"], raw["v2"], eps)

    w1p = jnp.pad(w1f, ((0, kp - in_f), (0, hp - hidden))).astype(jnp.bfloat16)
    t1p = jnp.pad(t1.reshape(1, -1), ((0, 0), (0, hp - hidden))).astype(jnp.float32)
    w2p = jnp.pad(w2f, ((0, hp - hidden), (0, hp - hidden))).astype(jnp.bfloat16)
    t2p = jnp.pad(t2.reshape(1, -1), ((0, 0), (0, hp - hidden))).astype(jnp.float32)
    w3p = jnp.pad(raw["w3"], ((0, hp - hidden), (0, cp - num_classes))
                  ).astype(jnp.bfloat16)
    b3p = jnp.pad(raw["b3"].reshape(1, -1).astype(jnp.float32),
                  ((0, 0), (0, cp - num_classes)), constant_values=-1e30)

    # Double-buffered bf16 weights must stay well inside VMEM on all gens.
    weight_bytes = 2 * 2 * (w1p.size + w2p.size + w3p.size)
    assert weight_bytes <= _FUSED_WEIGHT_BUDGET, (
        "weights too large for the fused VMEM-resident kernel; use a streamed "
        "per-layer variant")  # TODO(synk): streamed path for full-size model.

    return dict(w1=w1p, t1=t1p, w2=w2p, t2=t2p, w3=w3p, b3=b3p)


def build_forward(num_classes):
    @jax.jit
    def forward(params, x):
        return fused_forward(x, params, num_classes)
    return forward


def reference_forward(raw, x, eps=1e-5):
    def layer(h, w, b, g, be, m, v):
        z = h @ w + b
        z = (z - m) / jnp.sqrt(v + eps) * g + be
        return jnp.tanh(z)
    h = layer(x, raw["w1"], raw["b1"], raw["g1"], raw["be1"], raw["m1"], raw["v1"])
    h = layer(h, raw["w2"], raw["b2"], raw["g2"], raw["be2"], raw["m2"], raw["v2"])
    return jax.nn.softmax(h @ raw["w3"] + raw["b3"], axis=-1)


if __name__ == "__main__":
    # Small, lane-aligned shapes consistent with the module's [B, features] MLP.
    B, IN_FEATURES, HIDDEN, NUM_CLASSES = 8, 512, 384, 128

    key = jax.random.PRNGKey(0)
    kx, kparam = jax.random.split(key)
    x = jax.random.normal(kx, (B, IN_FEATURES), jnp.float32)

    raw = init_params(kparam, IN_FEATURES, HIDDEN, NUM_CLASSES)
    params = prepare_params(raw)
    forward = build_forward(NUM_CLASSES)

    out = jax.block_until_ready(forward(params, x))

    assert out.shape == (B, NUM_CLASSES), out.shape
    assert bool(jnp.all(jnp.isfinite(out)))
    # softmax rows are probabilities (exact divide -> tight tolerance)
    assert bool(jnp.allclose(jnp.sum(out, axis=1), 1.0, atol=1e-3))
    # matches pure-JAX f32 reference (loose tol: bf16 weights/activations)
    ref = reference_forward(raw, x)
    assert bool(jnp.allclose(out, ref, atol=3e-2)), float(jnp.max(jnp.abs(out - ref)))

    print("KERNEL_OK")
</pallas_src>

<mosaic_0001>
module attributes {stable_mosaic.version = 11 : i64} {
  func.func @_fused_mlp_kernel(%arg0: i32, %arg1: memref<8x512xf32, #tpu.memory_space<vmem>>, %arg2: memref<512x384xbf16, #tpu.memory_space<vmem>>, %arg3: memref<1x384xf32, #tpu.memory_space<vmem>>, %arg4: memref<384x384xbf16, #tpu.memory_space<vmem>>, %arg5: memref<1x384xf32, #tpu.memory_space<vmem>>, %arg6: memref<384x128xbf16, #tpu.memory_space<vmem>>, %arg7: memref<1x128xf32, #tpu.memory_space<vmem>>, %arg8: memref<8x128xf32, #tpu.memory_space<vmem>>) attributes {dimension_semantics = [#tpu.dimension_semantics<parallel>], iteration_bounds = array<i64: 1>, scalar_prefetch = 0 : i64, scratch_operands = 0 : i64, tpu.core_type = #tpu.core_type<tc>, window_params = [{transform_indices = @transform_0, window_bounds = array<i64: 8, 512>}, {pipeline_mode = #tpu.pipeline_mode<synchronous>, transform_indices = @transform_1, window_bounds = array<i64: 512, 384>}, {pipeline_mode = #tpu.pipeline_mode<synchronous>, transform_indices = @transform_2, window_bounds = array<i64: 1, 384>}, {pipeline_mode = #tpu.pipeline_mode<synchronous>, transform_indices = @transform_3, window_bounds = array<i64: 384, 384>}, {pipeline_mode = #tpu.pipeline_mode<synchronous>, transform_indices = @transform_4, window_bounds = array<i64: 1, 384>}, {pipeline_mode = #tpu.pipeline_mode<synchronous>, transform_indices = @transform_5, window_bounds = array<i64: 384, 128>}, {pipeline_mode = #tpu.pipeline_mode<synchronous>, transform_indices = @transform_6, window_bounds = array<i64: 1, 128>}, {transform_indices = @transform_7, window_bounds = array<i64: 8, 128>}]} {
    %c0 = arith.constant 0 : index
    %c0_0 = arith.constant 0 : index
    %0 = vector.load %arg1[%c0, %c0_0] : memref<8x512xf32, #tpu.memory_space<vmem>>, vector<8x512xf32>
    %1 = arith.truncf %0 : vector<8x512xf32> to vector<8x512xbf16>
    %c0_1 = arith.constant 0 : index
    %c0_2 = arith.constant 0 : index
    %2 = vector.load %arg2[%c0_1, %c0_2] : memref<512x384xbf16, #tpu.memory_space<vmem>>, vector<512x384xbf16>
    %cst = arith.constant dense<0.000000e+00> : vector<8x384xf32>
    %3 = tpu.matmul %1, %2, %cst {dimension_numbers = #tpu.dot_dimension_numbers<[1], [0], [0], [1], [0, 0, 1, 1], [], []>} : vector<8x512xbf16>, vector<512x384xbf16>, vector<8x384xf32> -> vector<8x384xf32>
    %c0_3 = arith.constant 0 : index
    %c0_4 = arith.constant 0 : index
    %4 = vector.load %arg3[%c0_3, %c0_4] : memref<1x384xf32, #tpu.memory_space<vmem>>, vector<1x384xf32>
    %5 = vector.broadcast %4 : vector<1x384xf32> to vector<8x384xf32>
    %6 = arith.addf %3, %5 : vector<8x384xf32>
    %7 = math.tanh %6 : vector<8x384xf32>
    %8 = arith.truncf %7 : vector<8x384xf32> to vector<8x384xbf16>
    %c0_5 = arith.constant 0 : index
    %c0_6 = arith.constant 0 : index
    %9 = vector.load %arg4[%c0_5, %c0_6] : memref<384x384xbf16, #tpu.memory_space<vmem>>, vector<384x384xbf16>
    %cst_7 = arith.constant dense<0.000000e+00> : vector<8x384xf32>
    %10 = tpu.matmul %8, %9, %cst_7 {dimension_numbers = #tpu.dot_dimension_numbers<[1], [0], [0], [1], [0, 0, 1, 1], [], []>} : vector<8x384xbf16>, vector<384x384xbf16>, vector<8x384xf32> -> vector<8x384xf32>
    %c0_8 = arith.constant 0 : index
    %c0_9 = arith.constant 0 : index
    %11 = vector.load %arg5[%c0_8, %c0_9] : memref<1x384xf32, #tpu.memory_space<vmem>>, vector<1x384xf32>
    %12 = vector.broadcast %11 : vector<1x384xf32> to vector<8x384xf32>
    %13 = arith.addf %10, %12 : vector<8x384xf32>
    %14 = math.tanh %13 : vector<8x384xf32>
    %15 = arith.truncf %14 : vector<8x384xf32> to vector<8x384xbf16>
    %c0_10 = arith.constant 0 : index
    %c0_11 = arith.constant 0 : index
    %16 = vector.load %arg6[%c0_10, %c0_11] : memref<384x128xbf16, #tpu.memory_space<vmem>>, vector<384x128xbf16>
    %cst_12 = arith.constant dense<0.000000e+00> : vector<8x128xf32>
    %17 = tpu.matmul %15, %16, %cst_12 {dimension_numbers = #tpu.dot_dimension_numbers<[1], [0], [0], [1], [0, 0, 1, 1], [], []>} : vector<8x384xbf16>, vector<384x128xbf16>, vector<8x128xf32> -> vector<8x128xf32>
    %c0_13 = arith.constant 0 : index
    %c0_14 = arith.constant 0 : index
    %18 = vector.load %arg7[%c0_13, %c0_14] : memref<1x128xf32, #tpu.memory_space<vmem>>, vector<1x128xf32>
    %19 = vector.broadcast %18 : vector<1x128xf32> to vector<8x128xf32>
    %20 = arith.addf %17, %19 : vector<8x128xf32>
    %cst_15 = arith.constant dense<0xFF800000> : vector<8xf32>
    %21 = vector.multi_reduction <maximumf>, %20, %cst_15 [1] : vector<8x128xf32> to vector<8xf32>
    %22 = vector.shape_cast %21 : vector<8xf32> to vector<8x1xf32>
    %23 = vector.broadcast %22 : vector<8x1xf32> to vector<8x128xf32>
    %24 = arith.subf %20, %23 : vector<8x128xf32>
    %25 = math.exp %24 : vector<8x128xf32>
    %cst_16 = arith.constant dense<0.000000e+00> : vector<8xf32>
    %26 = vector.multi_reduction <add>, %25, %cst_16 [1] : vector<8x128xf32> to vector<8xf32>
    %27 = vector.shape_cast %26 : vector<8xf32> to vector<8x1xf32>
    %28 = vector.broadcast %27 : vector<8x1xf32> to vector<8x128xf32>
    %29 = arith.divf %25, %28 : vector<8x128xf32>
    %c0_17 = arith.constant 0 : index
    %c0_18 = arith.constant 0 : index
    %30 = vector.load %arg8[%c0_17, %c0_18] : memref<8x128xf32, #tpu.memory_space<vmem>>, vector<8x128xf32>
    tpu.vector_store %arg8[%c0_17, %c0_18], %29 {strides = array<i32>} : memref<8x128xf32, #tpu.memory_space<vmem>>, vector<8x128xf32>,
    return
  }
  func.func @transform_0(%arg0: i32) -> (i32, i32) {
    %c0_i32 = arith.constant 0 : i32
    %c0_i32_0 = arith.constant 0 : i32
    return %arg0, %c0_i32 : i32, i32
  }
  func.func @transform_1(%arg0: i32) -> (i32, i32) {
    %c0_i32 = arith.constant 0 : i32
    %c0_i32_0 = arith.constant 0 : i32
    %c0_i32_1 = arith.constant 0 : i32
    return %c0_i32, %c0_i32_0 : i32, i32
  }
  func.func @transform_2(%arg0: i32) -> (i32, i32) {
    %c0_i32 = arith.constant 0 : i32
    %c0_i32_0 = arith.constant 0 : i32
    %c0_i32_1 = arith.constant 0 : i32
    return %c0_i32, %c0_i32_0 : i32, i32
  }
  func.func @transform_3(%arg0: i32) -> (i32, i32) {
    %c0_i32 = arith.constant 0 : i32
    %c0_i32_0 = arith.constant 0 : i32
    %c0_i32_1 = arith.constant 0 : i32
    return %c0_i32, %c0_i32_0 : i32, i32
  }
  func.func @transform_4(%arg0: i32) -> (i32, i32) {
    %c0_i32 = arith.constant 0 : i32
    %c0_i32_0 = arith.constant 0 : i32
    %c0_i32_1 = arith.constant 0 : i32
    return %c0_i32, %c0_i32_0 : i32, i32
  }
  func.func @transform_5(%arg0: i32) -> (i32, i32) {
    %c0_i32 = arith.constant 0 : i32
    %c0_i32_0 = arith.constant 0 : i32
    %c0_i32_1 = arith.constant 0 : i32
    return %c0_i32, %c0_i32_0 : i32, i32
  }
  func.func @transform_6(%arg0: i32) -> (i32, i32) {
    %c0_i32 = arith.constant 0 : i32
    %c0_i32_0 = arith.constant 0 : i32
    %c0_i32_1 = arith.constant 0 : i32
    return %c0_i32, %c0_i32_0 : i32, i32
  }
  func.func @transform_7(%arg0: i32) -> (i32, i32) {
    %c0_i32 = arith.constant 0 : i32
    %c0_i32_0 = arith.constant 0 : i32
    return %arg0, %c0_i32 : i32, i32
  }
}

</mosaic_0001>

<bundles_post_ra>
// kernel: forward.1
= control target key start
LH: loop header
LB: loop body
LE: loop exit
PB: predicated region body
PF: predicated region fallthrough
CT: control target
= control target key end

     0   :  { %12 = vsyncpa [#allocation3], 0  ;;  %s3132_s0 = inlined_call_operand.hbm [shape: f32[8,512], index: 0, kind: input, shape index: {}]   ;;  %s3133_s1 = inlined_call_operand.hbm [shape: bf16[512,384], index: 1, kind: input, shape index: {}]   ;;  %s3134_s2 = inlined_call_operand.hbm [shape: f32[1,384], index: 2, kind: input, shape index: {}]   ;;  %s3135_s3 = inlined_call_operand.hbm [shape: bf16[384,384], index: 3, kind: input, shape index: {}]   ;;  %s3136_s4 = inlined_call_operand.hbm [shape: f32[1,384], index: 4, kind: input, shape index: {}]   ;;  %s3137_s5 = inlined_call_operand.hbm [shape: bf16[384,128], index: 5, kind: input, shape index: {}]   ;;  %s3138_s6 = inlined_call_operand.hbm [shape: f32[1,128], index: 6, kind: input, shape index: {}]   ;;  %s3139_s7 = inlined_call_operand.hbm [shape: f32[8,128], index: 7, kind: output, shape index: {}]  }
   0x1   :  { %13 = vsyncpa [#allocation6], 0 }
   0x2   :  { %14 = vsyncpa [#allocation9], 0 }
   0x3   :  { %15 = vsyncpa [#allocation12], 0  ;;  %s32_s26 = sshll.u32 %s3133_s1, 4  ;;  %s33_s26 = int_to_ptr.hbm [resolvable:$true] %s32_s26 }
   0x4   :  { %16 = vsyncpa [#allocation4], 0  ;;  %s3026_s27 = smov [#allocation5]   ;;  %s56_s8 = sshll.u32 %s3135_s3, 4  ;;  %s57_s8 = int_to_ptr.hbm [resolvable:$true] %s56_s8 }
   0x5   :  { %s34_s28 = sshll.u32 %s3026_s27, 4  ;;  %s3027_s9 = smov 192   ;;  %s35_s28 = int_to_ptr.vmem [resolvable:$true] %s34_s28 }
   0x6   :  { %s3028_s10 = smov 12   ;;  %s3029_s11 = smov [#allocation8]  }
   0x7   :  { %40 = dma.hbm_to_vmem [thread:$0]  %s33_s26, 12288, %s35_s28, [#allocation6], %s3027_s9, %s3027_s9, %s3028_s10  }
   0x8   :  { %s58_s12 = sshll.u32 %s3029_s11, 4  ;;  %s80_s15 = sshll.u32 %s3137_s5, 4  ;;  %s59_s12 = int_to_ptr.vmem [resolvable:$true] %s58_s12  ;;  %s81_s15 = int_to_ptr.hbm [resolvable:$true] %s80_s15 }
   0x9   :  { %64 = dma.hbm_to_vmem [thread:$0]  %s57_s8, 9216, %s59_s12, [#allocation9], %s3027_s9, %s3027_s9, %s3028_s10  }
   0xa   :  { %s3030_s1 = smov [#allocation11]   ;;  %s22_s3 = sshll.u32 %s3132_s0, 4  ;;  %s23_s3 = int_to_ptr.hbm [resolvable:$true] %s22_s3 }
   0xb   :  { %s82_s16 = sshll.u32 %s3030_s1, 4  ;;  %s3031_s19 = smov 64   ;;  %s83_s16 = int_to_ptr.vmem [resolvable:$true] %s82_s16 }
   0xc   :  { %s3032_s20 = smov 4   ;;  %s3033_s21 = smov [#allocation2]  }
   0xd   :  { %88 = dma.hbm_to_vmem [thread:$0]  %s81_s15, 3072, %s83_s16, [#allocation12], %s3031_s19, %s3031_s19, %s3032_s20  }
   0xe   :  { %s24_s22 = sshll.u32 %s3033_s21, 4  ;;  %s46_s5 = sshll.u32 %s3134_s2, 4  ;;  %s25_s22 = int_to_ptr.vmem [resolvable:$true] %s24_s22  ;;  %s47_s5 = int_to_ptr.hbm [resolvable:$true] %s46_s5 }
   0xf   :  { %27 = dma.hbm_to_vmem [thread:$0]  %s23_s3, 512, %s25_s22, [#allocation3]  }
  0x10   :  { %s70_s27 = sshll.u32 %s3136_s4, 4  ;;  %s3034_s28 = smov [#allocation7]   ;;  %s71_s27 = int_to_ptr.hbm [resolvable:$true] %s70_s27 }
  0x11   :  { %s48_s29 = sshll.u32 %s3034_s28, 4  ;;  %s3035_s0 = smov [#allocation10]   ;;  %s49_s29 = int_to_ptr.vmem [resolvable:$true] %s48_s29 }
  0x12   :  { %51 = dma.hbm_to_vmem [thread:$0]  %s47_s5, 48, %s49_s29, [#allocation6]  }
  0x13   :  { %s72_s30 = sshll.u32 %s3035_s0, 4  ;;  %s94_s10 = sshll.u32 %s3138_s6, 4  ;;  %s73_s30 = int_to_ptr.vmem [resolvable:$true] %s72_s30  ;;  %s95_s10 = int_to_ptr.hbm [resolvable:$true] %s94_s10 }
  0x14   :  { %75 = dma.hbm_to_vmem [thread:$0]  %s71_s27, 48, %s73_s30, [#allocation9]  }
  0x15   :  { %s3036_s2 = smov [#allocation13]  }
  0x16   :  { %s96_s11 = sshll.u32 %s3036_s2, 4  ;;  %s97_s11 = int_to_ptr.vmem [resolvable:$true] %s96_s11 }
  0x17   :  { %99 = dma.hbm_to_vmem [thread:$0]  %s95_s10, 16, %s97_s11, [#allocation12]  }
  0x18   :  { %3016 = dma.done.wait [#allocation3], 512  }
  0x19   :  { %3017 = vsyncadd [#allocation3], 4294966784 }
  0x1a   :  { %3018 = dma.done.wait [#allocation6], 12336  }
  0x1b   :  { %3019 = vsyncadd [#allocation6], 4294954960 }
  0x1c   :  { %3020 = dma.done.wait [#allocation9], 9264  }
  0x1d   :  { %3021 = vsyncadd [#allocation9], 4294958032 }
  0x1e   :  { %3022 = dma.done.wait [#allocation12], 3088  }
  0x1f   :  { %3023 = vsyncadd [#allocation12], 4294964208  ;;  %v1921_v0 = vld [vmem:[#allocation5 + $0xa8] sm:$0xf]  ;;  %v2625_v1 = vld [vmem:[#allocation5 + $0xb0] sm:$0xf0] }
  0x20   :  { %v2017_v2 = vld [vmem:[#allocation5 + $0x168] sm:$0xf]  ;;  %v1922_v3 = vor.u32 %v2625_v1, %v1921_v0  ;;  %v2649_v4 = vld [vmem:[#allocation5 + $0x170] sm:$0xf0]  ;;  %v1909_v11 = vld [vmem:[#allocation5 + $0x90] sm:$0xf] }
  0x21   :  { %v2113_v5 = vld [vmem:[#allocation5 + $0x228] sm:$0xf]  ;;  %v2673_v6 = vld [vmem:[#allocation5 + $0x230] sm:$0xf0]  ;;  %v2018_v7 = vor.u32 %v2649_v4, %v2017_v2  ;;  %v2622_v13 = vld [vmem:[#allocation5 + $0x98] sm:$0xf0] }
  0x22   :  { %v2114_v8 = vor.u32 %v2673_v6, %v2113_v5  ;;  %v2209_v9 = vld [vmem:[#allocation5 + $0x2e8] sm:$0xf]  ;;  %v2697_v10 = vld [vmem:[#allocation5 + $0x2f0] sm:$0xf0]  ;;  %784 = vmatpush.bf16.msra.mxu0 %v1922_v3  ;;  %v2005_v14 = vld [vmem:[#allocation5 + $0x150] sm:$0xf]  ;;  %v1910_v16 = vor.u32 %v2622_v13, %v1909_v11 }
  0x23   :  { %v2210_v12 = vor.u32 %v2697_v10, %v2209_v9  ;;  %v2646_v15 = vld [vmem:[#allocation5 + $0x158] sm:$0xf0]  ;;  %797 = vmatpush.bf16.msra.mxu1 %v2018_v7  ;;  %v2101_v18 = vld [vmem:[#allocation5 + $0x210] sm:$0xf]  ;;  %v1897_v23 = vld [vmem:[#allocation5 + $0x78] sm:$0xf] }
  0x24   :  { %810 = vmatpush.bf16.msra.mxu2 %v2114_v8  ;;  %v2006_v17 = vor.u32 %v2646_v15, %v2005_v14  ;;  %v2670_v19 = vld [vmem:[#allocation5 + $0x218] sm:$0xf0]  ;;  %v2197_v20 = vld [vmem:[#allocation5 + $0x2d0] sm:$0xf]  ;;  %v2619_v24 = vld [vmem:[#allocation5 + $0x80] sm:$0xf0] }
  0x25   :  { %823 = vmatpush.bf16.msra.mxu3 %v2210_v12  ;;  %v2102_v21 = vor.u32 %v2670_v19, %v2101_v18  ;;  %v2694_v22 = vld [vmem:[#allocation5 + $0x2d8] sm:$0xf0]  ;;  %v1993_v26 = vld [vmem:[#allocation5 + $0x138] sm:$0xf]  ;;  %v2643_v27 = vld [vmem:[#allocation5 + $0x140] sm:$0xf0]  ;;  %v1898_v29 = vor.u32 %v2619_v24, %v1897_v23 }
  0x26   :  { %v2198_v25 = vor.u32 %v2694_v22, %v2197_v20  ;;  %v2089_v28 = vld [vmem:[#allocation5 + $0x1f8] sm:$0xf]  ;;  %785 = vmatpush.bf16.msra.mxu0 %v1910_v16  ;;  %v2667_v30 = vld [vmem:[#allocation5 + $0x200] sm:$0xf0]  ;;  %v1994_v33 = vor.u32 %v2643_v27, %v1993_v26  ;;  %v1885_v35 = vld [vmem:[#allocation5 + $0x60] sm:$0xf] }
  0x27   :  { %v2185_v31 = vld [vmem:[#allocation5 + $0x2b8] sm:$0xf]  ;;  %v2691_v32 = vld [vmem:[#allocation5 + $0x2c0] sm:$0xf0]  ;;  %798 = vmatpush.bf16.msra.mxu1 %v2006_v17  ;;  %v2090_v34 = vor.u32 %v2667_v30, %v2089_v28  ;;  %v2616_v36 = vld [vmem:[#allocation5 + $0x68] sm:$0xf0] }
  0x28   :  { %811 = vmatpush.bf16.msra.mxu2 %v2102_v21  ;;  %v1981_v37 = vld [vmem:[#allocation5 + $0x120] sm:$0xf]  ;;  %v2186_v38 = vor.u32 %v2691_v32, %v2185_v31  ;;  %v2640_v39 = vld [vmem:[#allocation5 + $0x128] sm:$0xf0]  ;;  %v1886_v44 = vor.u32 %v2616_v36, %v1885_v35  ;;  %v1873_v47 = vld [vmem:[#allocation5 + $0x48] sm:$0xf] }
  0x29   :  { %824 = vmatpush.bf16.msra.mxu3 %v2198_v25  ;;  %v2077_v40 = vld [vmem:[#allocation5 + $0x1e0] sm:$0xf]  ;;  %v2664_v41 = vld [vmem:[#allocation5 + $0x1e8] sm:$0xf0]  ;;  %v1982_v45 = vor.u32 %v2640_v39, %v1981_v37  ;;  %v2613_v48 = vld [vmem:[#allocation5 + $0x50] sm:$0xf0] }
  0x2a   :  { %v2173_v42 = vld [vmem:[#allocation5 + $0x2a0] sm:$0xf]  ;;  %v2688_v43 = vld [vmem:[#allocation5 + $0x2a8] sm:$0xf0]  ;;  %786 = vmatpush.bf16.msra.mxu0 %v1898_v29  ;;  %v2078_v46 = vor.u32 %v2664_v41, %v2077_v40  ;;  %v1969_v49 = vld [vmem:[#allocation5 + $0x108] sm:$0xf]  ;;  %v1874_v56 = vor.u32 %v2613_v48, %v1873_v47 }
  0x2b   :  { %799 = vmatpush.bf16.msra.mxu1 %v1994_v33  ;;  %v2174_v50 = vor.u32 %v2688_v43, %v2173_v42  ;;  %v2637_v51 = vld [vmem:[#allocation5 + $0x110] sm:$0xf0]  ;;  %v2065_v52 = vld [vmem:[#allocation5 + $0x1c8] sm:$0xf]  ;;  %v1861_v59 = vld [vmem:[#allocation5 + $0x30] sm:$0xf] }
  0x2c   :  { %812 = vmatpush.bf16.msra.mxu2 %v2090_v34  ;;  %v2661_v53 = vld [vmem:[#allocation5 + $0x1d0] sm:$0xf0]  ;;  %v2161_v54 = vld [vmem:[#allocation5 + $0x288] sm:$0xf]  ;;  %v1970_v57 = vor.u32 %v2637_v51, %v1969_v49  ;;  %v2610_v60 = vld [vmem:[#allocation5 + $0x38] sm:$0xf0] }
  0x2d   :  { %825 = vmatpush.bf16.msra.mxu3 %v2186_v38  ;;  %v2685_v55 = vld [vmem:[#allocation5 + $0x290] sm:$0xf0]  ;;  %v2066_v58 = vor.u32 %v2661_v53, %v2065_v52  ;;  %v1957_v61 = vld [vmem:[#allocation5 + $0xf0] sm:$0xf]  ;;  %v2634_v63 = vld [vmem:[#allocation5 + $0xf8] sm:$0xf0]  ;;  %v1862_v4 = vor.u32 %v2610_v60, %v1861_v59 }
  0x2e   :  { %787 = vmatpush.bf16.msra.mxu0 %v1886_v44  ;;  %v2162_v62 = vor.u32 %v2685_v55, %v2161_v54  ;;  %v2053_v0 = vld [vmem:[#allocation5 + $0x1b0] sm:$0xf]  ;;  %v2658_v1 = vld [vmem:[#allocation5 + $0x1b8] sm:$0xf0]  ;;  %v1958_v5 = vor.u32 %v2634_v63, %v1957_v61  ;;  %v1849_v7 = vld [vmem:[#allocation5 + $0x18] sm:$0xf] }
  0x2f   :  { %800 = vmatpush.bf16.msra.mxu1 %v1982_v45  ;;  %v2149_v2 = vld [vmem:[#allocation5 + $0x270] sm:$0xf]  ;;  %v2682_v3 = vld [vmem:[#allocation5 + $0x278] sm:$0xf0]  ;;  %v2054_v6 = vor.u32 %v2658_v1, %v2053_v0  ;;  %v2607_v8 = vld [vmem:[#allocation5 + $0x20] sm:$0xf0] }
  0x30   :  { %813 = vmatpush.bf16.msra.mxu2 %v2078_v46  ;;  %v1945_v9 = vld [vmem:[#allocation5 + $0xd8] sm:$0xf]  ;;  %v2150_v10 = vor.u32 %v2682_v3, %v2149_v2  ;;  %v2631_v11 = vld [vmem:[#allocation5 + $0xe0] sm:$0xf0]  ;;  %v1850_v16 = vor.u32 %v2607_v8, %v1849_v7  ;;  %v1837_v17 = vld [vmem:[#allocation5] sm:$0xf] }
  0x31   :  { %826 = vmatpush.bf16.msra.mxu3 %v2174_v50  ;;  %v2041_v12 = vld [vmem:[#allocation5 + $0x198] sm:$0xf]  ;;  %v2655_v13 = vld [vmem:[#allocation5 + $0x1a0] sm:$0xf0]  ;;  %v2604_v18 = vld [vmem:[#allocation5 + $0x8] sm:$0xf0]  ;;  %v1946_v19 = vor.u32 %v2631_v11, %v1945_v9 }
  0x32   :  { %788 = vmatpush.bf16.msra.mxu0 %v1874_v56  ;;  %v2137_v14 = vld [vmem:[#allocation5 + $0x258] sm:$0xf]  ;;  %v2679_v15 = vld [vmem:[#allocation5 + $0x260] sm:$0xf0]  ;;  %v2042_v20 = vor.u32 %v2655_v13, %v2041_v12  ;;  %v1933_v21 = vld [vmem:[#allocation5 + $0xc0] sm:$0xf]  ;;  %v1838_v31 = vor.u32 %v2604_v18, %v1837_v17 }
  0x33   :  { %801 = vmatpush.bf16.msra.mxu1 %v1970_v57  ;;  %v2628_v22 = vld [vmem:[#allocation5 + $0xc8] sm:$0xf0]  ;;  %v2029_v23 = vld [vmem:[#allocation5 + $0x180] sm:$0xf]  ;;  %v2138_v24 = vor.u32 %v2679_v15, %v2137_v14  ;;  %v1923_v29 = vld [vmem:[#allocation5 + $0xb4] sm:$0xf0] }
  0x34   :  { %814 = vmatpush.bf16.msra.mxu2 %v2066_v58  ;;  %v2652_v25 = vld [vmem:[#allocation5 + $0x188] sm:$0xf0]  ;;  %v2125_v26 = vld [vmem:[#allocation5 + $0x240] sm:$0xf]  ;;  %v2019_v32 = vld [vmem:[#allocation5 + $0x174] sm:$0xf0]  ;;  %v1934_v35 = vor.u32 %v2628_v22, %v1933_v21 }
  0x35   :  { %827 = vmatpush.bf16.msra.mxu3 %v2162_v62  ;;  %v2676_v27 = vld [vmem:[#allocation5 + $0x248] sm:$0xf0]  ;;  %v2115_v34 = vld [vmem:[#allocation5 + $0x234] sm:$0xf0]  ;;  %v2030_v36 = vor.u32 %v2652_v25, %v2029_v23  ;;  %v2621_v43 = vld [vmem:[#allocation5 + $0x94] sm:$0xf] }
  0x36   :  { %789 = vmatpush.bf16.msra.mxu0 %v1862_v4  ;;  %v2624_v28 = vld [vmem:[#allocation5 + $0xac] sm:$0xf]  ;;  %v2211_v38 = vld [vmem:[#allocation5 + $0x2f4] sm:$0xf0]  ;;  %v2126_v39 = vor.u32 %v2676_v27, %v2125_v26  ;;  %v1911_v44 = vld [vmem:[#allocation5 + $0x9c] sm:$0xf0] }
  0x37   :  { %802 = vmatpush.bf16.msra.mxu1 %v1958_v5  ;;  %v2648_v30 = vld [vmem:[#allocation5 + $0x16c] sm:$0xf]  ;;  %v1926_v40 = vor.u32 %v2624_v28, %v1923_v29  ;;  %v2645_v45 = vld [vmem:[#allocation5 + $0x154] sm:$0xf]  ;;  %v2007_v47 = vld [vmem:[#allocation5 + $0x15c] sm:$0xf0]  ;;  %v1914_v53 = vor.u32 %v2621_v43, %v1911_v44 }
  0x38   :  { %815 = vmatpush.bf16.msra.mxu2 %v2054_v6  ;;  %v2672_v33 = vld [vmem:[#allocation5 + $0x22c] sm:$0xf]  ;;  %v2022_v41 = vor.u32 %v2648_v30, %v2019_v32  ;;  %v2669_v48 = vld [vmem:[#allocation5 + $0x214] sm:$0xf]  ;;  %v2103_v49 = vld [vmem:[#allocation5 + $0x21c] sm:$0xf0]  ;;  %v2010_v58 = vor.u32 %v2645_v45, %v2007_v47 }
  0x39   :  { %828 = vmatpush.bf16.msra.mxu3 %v2150_v10  ;;  %v2696_v37 = vld [vmem:[#allocation5 + $0x2ec] sm:$0xf]  ;;  %v2118_v42 = vor.u32 %v2672_v33, %v2115_v34  ;;  %v2693_v50 = vld [vmem:[#allocation5 + $0x2d4] sm:$0xf]  ;;  %v2199_v51 = vld [vmem:[#allocation5 + $0x2dc] sm:$0xf0]  ;;  %v2106_v59 = vor.u32 %v2669_v48, %v2103_v49 }
  0x3a   :  { %790 = vmatpush.bf16.msra.mxu0 %v1850_v16  ;;  %v2214_v46 = vor.u32 %v2696_v37, %v2211_v38  ;;  %v130_v52 = vld [vmem:[#allocation2 + $0x10] sm:$0xff]  ;;  %v2618_v54 = vld [vmem:[#allocation5 + $0x7c] sm:$0xf]  ;;  %v1899_v55 = vld [vmem:[#allocation5 + $0x84] sm:$0xf0]  ;;  %v2202_v63 = vor.u32 %v2693_v50, %v2199_v51  ;;  %s3037_s4 = smov [#allocation14]  }
  0x3b   :  { %803 = vmatpush.bf16.msra.mxu1 %v1946_v19  ;;  %v2642_v56 = vld [vmem:[#allocation5 + $0x13c] sm:$0xf]  ;;  %v3099_v57 = vpack.c.bf16 %v130_v52, %v130_v52  ;;  %v1995_v60 = vld [vmem:[#allocation5 + $0x144] sm:$0xf0]  ;;  %v128_v0 = vld [vmem:[#allocation2] sm:$0xff]  ;;  %v1902_v8 = vor.u32 %v2618_v54, %v1899_v55  ;;  %s1820_s6 = sshll.u32 %s3037_s4, 4  ;;  %s1821_s6 = int_to_ptr.vmem [resolvable:$true] %s1820_s6 }
  0x3c   :  { %816 = vmatpush.bf16.msra.mxu2 %v2042_v20  ;;  %v2666_v61 = vld [vmem:[#allocation5 + $0x1fc] sm:$0xf]  ;;  %v2091_v62 = vld [vmem:[#allocation5 + $0x204] sm:$0xf0]  ;;  %v3102_v5 = vpack.c.bf16 %v128_v0, %v128_v0  ;;  %v1998_v9 = vor.u32 %v2642_v56, %v1995_v60  ;;  %v2615_v11 = vld [vmem:[#allocation5 + $0x64] sm:$0xf] }
  0x3d   :  { %829 = vmatpush.bf16.msra.mxu3 %v2138_v24  ;;  %v131_v1 = vld [vmem:[#allocation2 + $0x18] sm:$0xff]  ;;  %v129_v2 = vld [vmem:[#allocation2 + $0x8] sm:$0xff]  ;;  %v2094_v10 = vor.u32 %v2666_v61, %v2091_v62  ;;  %v1887_v12 = vld [vmem:[#allocation5 + $0x6c] sm:$0xf0]  ;;  %s1822_s14 = sshll.u32 %s3139_s7, 4  ;;  %s1823_s14 = int_to_ptr.hbm [resolvable:$true] %s1822_s14 }
  0x3e   :  { %791 = vmatpush.bf16.msra.mxu0 %v1838_v31  ;;  %v2690_v3 = vld [vmem:[#allocation5 + $0x2bc] sm:$0xf]  ;;  %v2187_v4 = vld [vmem:[#allocation5 + $0x2c4] sm:$0xf0]  ;;  %v3104_v6 = vpack.c.bf16 %v131_v1, %v131_v1  ;;  %v3106_v7 = vpack.c.bf16 %v129_v2, %v129_v2  ;;  %v2639_v13 = vld [vmem:[#allocation5 + $0x124] sm:$0xf]  ;;  %v1890_v20 = vor.u32 %v2615_v11, %v1887_v12 }
  0x3f   :  { %804 = vmatpush.bf16.msra.mxu1 %v1934_v35  ;;  %v2190_v14 = vor.u32 %v2690_v3, %v2187_v4  ;;  %v1983_v15 = vld [vmem:[#allocation5 + $0x12c] sm:$0xf0]  ;;  %v2663_v16 = vld [vmem:[#allocation5 + $0x1e4] sm:$0xf]  ;;  %v2612_v23 = vld [vmem:[#allocation5 + $0x4c] sm:$0xf] }
  0x40   :  { %817 = vmatpush.bf16.msra.mxu2 %v2030_v36  ;;  %v2079_v17 = vld [vmem:[#allocation5 + $0x1ec] sm:$0xf0]  ;;  %v2687_v18 = vld [vmem:[#allocation5 + $0x2a4] sm:$0xf]  ;;  %v1986_v21 = vor.u32 %v2639_v13, %v1983_v15  ;;  %v1875_v24 = vld [vmem:[#allocation5 + $0x54] sm:$0xf0] }
  0x41   :  { %830 = vmatpush.bf16.msra.mxu3 %v2126_v39  ;;  %792 = vmatmul.bf16.vlgmr.msra.gmra.mxu0 %v3102_v5  ;;  %v2175_v19 = vld [vmem:[#allocation5 + $0x2ac] sm:$0xf0]  ;;  %v2082_v22 = vor.u32 %v2663_v16, %v2079_v17  ;;  %v2636_v25 = vld [vmem:[#allocation5 + $0x10c] sm:$0xf]  ;;  %v1971_v27 = vld [vmem:[#allocation5 + $0x114] sm:$0xf0]  ;;  %v1878_v32 = vor.u32 %v2612_v23, %v1875_v24 }
  0x42   :  { %836 = vmatpush.bf16.msrb.mxu0 %v1926_v40  ;;  %805 = vmatmul.bf16.vlgmr.msra.gmra.mxu1 %v3106_v7  ;;  %v2178_v26 = vor.u32 %v2687_v18, %v2175_v19  ;;  %v2660_v28 = vld [vmem:[#allocation5 + $0x1cc] sm:$0xf]  ;;  %v2067_v29 = vld [vmem:[#allocation5 + $0x1d4] sm:$0xf0]  ;;  %v1974_v33 = vor.u32 %v2636_v25, %v1971_v27  ;;  %v2609_v35 = vld [vmem:[#allocation5 + $0x34] sm:$0xf] }
  0x43   :  { %849 = vmatpush.bf16.msrb.mxu1 %v2022_v41  ;;  %818 = vmatmul.bf16.vlgmr.msra.gmra.mxu2 %v3099_v57  ;;  %v2684_v30 = vld [vmem:[#allocation5 + $0x28c] sm:$0xf]  ;;  %v2163_v31 = vld [vmem:[#allocation5 + $0x294] sm:$0xf0]  ;;  %v2070_v34 = vor.u32 %v2660_v28, %v2067_v29  ;;  %v1863_v36 = vld [vmem:[#allocation5 + $0x3c] sm:$0xf0] }
  0x44   :  { %862 = vmatpush.bf16.msrb.mxu2 %v2118_v42  ;;  %831 = vmatmul.bf16.vlgmr.msra.gmra.mxu3 %v3104_v6  ;;  %v2633_v37 = vld [vmem:[#allocation5 + $0xf4] sm:$0xf]  ;;  %v2166_v38 = vor.u32 %v2684_v30, %v2163_v31  ;;  %v1959_v39 = vld [vmem:[#allocation5 + $0xfc] sm:$0xf0]  ;;  %v1866_v44 = vor.u32 %v2609_v35, %v1863_v36  ;;  %v2606_v47 = vld [vmem:[#allocation5 + $0x1c] sm:$0xf] }
  0x45   :  { %875 = vmatpush.bf16.msrb.mxu3 %v2214_v46  ;;  %v2657_v40 = vld [vmem:[#allocation5 + $0x1b4] sm:$0xf]  ;;  %v2055_v41 = vld [vmem:[#allocation5 + $0x1bc] sm:$0xf0]  ;;  %v1962_v45 = vor.u32 %v2633_v37, %v1959_v39  ;;  %v1851_v48 = vld [vmem:[#allocation5 + $0x24] sm:$0xf0] }
  0x46   :  { %837 = vmatpush.bf16.msrb.mxu0 %v1914_v53  ;;  %v2681_v42 = vld [vmem:[#allocation5 + $0x274] sm:$0xf]  ;;  %v2151_v43 = vld [vmem:[#allocation5 + $0x27c] sm:$0xf0]  ;;  %v2058_v46 = vor.u32 %v2657_v40, %v2055_v41  ;;  %v2630_v49 = vld [vmem:[#allocation5 + $0xdc] sm:$0xf]  ;;  %v1854_v56 = vor.u32 %v2606_v47, %v1851_v48 }
  0x47   :  { %850 = vmatpush.bf16.msrb.mxu1 %v2010_v58  ;;  %v2154_v50 = vor.u32 %v2681_v42, %v2151_v43  ;;  %v1947_v51 = vld [vmem:[#allocation5 + $0xe4] sm:$0xf0]  ;;  %v2654_v52 = vld [vmem:[#allocation5 + $0x19c] sm:$0xf]  ;;  %v2603_v58 = vld [vmem:[#allocation5 + $0x4] sm:$0xf] }
  0x48   :  { %863 = vmatpush.bf16.msrb.mxu2 %v2106_v59  ;;  %v2043_v53 = vld [vmem:[#allocation5 + $0x1a4] sm:$0xf0]  ;;  %v2678_v54 = vld [vmem:[#allocation5 + $0x25c] sm:$0xf]  ;;  %v1839_v59 = vld [vmem:[#allocation5 + $0xc] sm:$0xf0]  ;;  %v1950_v60 = vor.u32 %v2630_v49, %v1947_v51 }
  0x49   :  { %876 = vmatpush.bf16.msrb.mxu3 %v2202_v63  ;;  %v2139_v55 = vld [vmem:[#allocation5 + $0x264] sm:$0xf0]  ;;  %v2046_v61 = vor.u32 %v2654_v52, %v2043_v53  ;;  %v2627_v62 = vld [vmem:[#allocation5 + $0xc4] sm:$0xf]  ;;  %v1935_v63 = vld [vmem:[#allocation5 + $0xcc] sm:$0xf0]  ;;  %v1842_v11 = vor.u32 %v2603_v58, %v1839_v59 }
  0x4a   :  { %838 = vmatpush.bf16.msrb.mxu0 %v1902_v8  ;;  %v2651_v0 = vld [vmem:[#allocation5 + $0x184] sm:$0xf]  ;;  %v2142_v1 = vor.u32 %v2678_v54, %v2139_v55  ;;  %v2031_v2 = vld [vmem:[#allocation5 + $0x18c] sm:$0xf0]  ;;  %v2650_v12 = vld [vmem:[#allocation5 + $0x178] sm:$0xf0]  ;;  %v1938_v15 = vor.u32 %v2627_v62, %v1935_v63 }
  0x4b   :  { %851 = vmatpush.bf16.msrb.mxu1 %v1998_v9  ;;  %v2675_v3 = vld [vmem:[#allocation5 + $0x244] sm:$0xf]  ;;  %v2127_v4 = vld [vmem:[#allocation5 + $0x24c] sm:$0xf0]  ;;  %v2626_v9 = vld [vmem:[#allocation5 + $0xb8] sm:$0xf0]  ;;  %v2034_v16 = vor.u32 %v2651_v0, %v2031_v2 }
  0x4c   :  { %864 = vmatpush.bf16.msrb.mxu2 %v2094_v10  ;;  %v1929_v8 = vld [vmem:[#allocation5 + $0xb0] sm:$0xf]  ;;  %v2698_v18 = vld [vmem:[#allocation5 + $0x2f8] sm:$0xf0]  ;;  %v2130_v19 = vor.u32 %v2675_v3, %v2127_v4  ;;  %v1917_v23 = vld [vmem:[#allocation5 + $0x98] sm:$0xf] }
  0x4d   :  { %877 = vmatpush.bf16.msrb.mxu3 %v2190_v14  ;;  %v2025_v10 = vld [vmem:[#allocation5 + $0x170] sm:$0xf]  ;;  %v2674_v14 = vld [vmem:[#allocation5 + $0x238] sm:$0xf0]  ;;  %v2623_v24 = vld [vmem:[#allocation5 + $0xa0] sm:$0xf0] }
  0x4e   :  { %839 = vmatpush.bf16.msrb.mxu0 %v1890_v20  ;;  %v2121_v13 = vld [vmem:[#allocation5 + $0x230] sm:$0xf]  ;;  %v1930_v20 = vor.u32 %v2626_v9, %v1929_v8  ;;  %v2013_v25 = vld [vmem:[#allocation5 + $0x158] sm:$0xf]  ;;  %v2647_v27 = vld [vmem:[#allocation5 + $0x160] sm:$0xf0] }
  0x4f   :  { %852 = vmatpush.bf16.msrb.mxu1 %v1986_v21  ;;  %v2217_v17 = vld [vmem:[#allocation5 + $0x2f0] sm:$0xf]  ;;  %v2026_v21 = vor.u32 %v2650_v12, %v2025_v10  ;;  %v2109_v28 = vld [vmem:[#allocation5 + $0x218] sm:$0xf]  ;;  %v2671_v29 = vld [vmem:[#allocation5 + $0x220] sm:$0xf0] }
  0x50   :  { %865 = vmatpush.bf16.msrb.mxu2 %v2082_v22  ;;  %v2122_v22 = vor.u32 %v2674_v14, %v2121_v13  ;;  %v2205_v30 = vld [vmem:[#allocation5 + $0x2d8] sm:$0xf]  ;;  %v2695_v31 = vld [vmem:[#allocation5 + $0x2e0] sm:$0xf0]  ;;  %v1905_v35 = vld [vmem:[#allocation5 + $0x80] sm:$0xf] }
  0x51   :  { %878 = vmatpush.bf16.msrb.mxu3 %v2178_v26  ;;  %v2218_v26 = vor.u32 %v2698_v18, %v2217_v17  ;;  %v2620_v36 = vld [vmem:[#allocation5 + $0x88] sm:$0xf0]  ;;  %v2001_v37 = vld [vmem:[#allocation5 + $0x140] sm:$0xf]  ;;  %v2617_v48 = vld [vmem:[#allocation5 + $0x70] sm:$0xf0] }
  0x52   :  { %840 = vmatpush.bf16.msrb.mxu0 %v1878_v32  ;;  %v1918_v32 = vor.u32 %v2623_v24, %v1917_v23  ;;  %v2644_v39 = vld [vmem:[#allocation5 + $0x148] sm:$0xf0]  ;;  %v2097_v40 = vld [vmem:[#allocation5 + $0x200] sm:$0xf]  ;;  %v1989_v49 = vld [vmem:[#allocation5 + $0x128] sm:$0xf] }
  0x53   :  { %853 = vmatpush.bf16.msrb.mxu1 %v1974_v33  ;;  %v2014_v33 = vor.u32 %v2647_v27, %v2013_v25  ;;  %v2668_v41 = vld [vmem:[#allocation5 + $0x208] sm:$0xf0]  ;;  %v2193_v42 = vld [vmem:[#allocation5 + $0x2c0] sm:$0xf]  ;;  %v2641_v51 = vld [vmem:[#allocation5 + $0x130] sm:$0xf0] }
  0x54   :  { %866 = vmatpush.bf16.msrb.mxu2 %v2070_v34  ;;  %v2110_v34 = vor.u32 %v2671_v29, %v2109_v28  ;;  %v2692_v43 = vld [vmem:[#allocation5 + $0x2c8] sm:$0xf0]  ;;  %v2098_v47 = vor.u32 %v2668_v41, %v2097_v40  ;;  %v2085_v52 = vld [vmem:[#allocation5 + $0x1e8] sm:$0xf]  ;;  %v2665_v53 = vld [vmem:[#allocation5 + $0x1f0] sm:$0xf0]  ;;  %v1990_v58 = vor.u32 %v2641_v51, %v1989_v49 }
  0x55   :  { %879 = vmatpush.bf16.msrb.mxu3 %v2166_v38  ;;  %v2206_v38 = vor.u32 %v2695_v31, %v2205_v30  ;;  %v2181_v54 = vld [vmem:[#allocation5 + $0x2a8] sm:$0xf]  ;;  %v2689_v55 = vld [vmem:[#allocation5 + $0x2b0] sm:$0xf0]  ;;  %v2086_v59 = vor.u32 %v2665_v53, %v2085_v52  ;;  %v1977_v62 = vld [vmem:[#allocation5 + $0x110] sm:$0xf] }
  0x56   :  { %841 = vmatpush.bf16.msrb.mxu0 %v1866_v44  ;;  %v1906_v44 = vor.u32 %v2620_v36, %v1905_v35  ;;  %v2182_v63 = vor.u32 %v2689_v55, %v2181_v54  ;;  %v2638_v0 = vld [vmem:[#allocation5 + $0x118] sm:$0xf0]  ;;  %v2169_v3 = vld [vmem:[#allocation5 + $0x290] sm:$0xf]  ;;  %v2611_v12 = vld [vmem:[#allocation5 + $0x40] sm:$0xf0] }
  0x57   :  { %854 = vmatpush.bf16.msrb.mxu1 %v1962_v45  ;;  %v1893_v45 = vld [vmem:[#allocation5 + $0x68] sm:$0xf]  ;;  %v2662_v2 = vld [vmem:[#allocation5 + $0x1d8] sm:$0xf0]  ;;  %v1978_v9 = vor.u32 %v2638_v0, %v1977_v62  ;;  %v1965_v13 = vld [vmem:[#allocation5 + $0xf8] sm:$0xf] }
  0x58   :  { %867 = vmatpush.bf16.msrb.mxu2 %v2058_v46  ;;  %v2002_v46 = vor.u32 %v2644_v39, %v2001_v37  ;;  %v2686_v4 = vld [vmem:[#allocation5 + $0x298] sm:$0xf0]  ;;  %v2659_v17 = vld [vmem:[#allocation5 + $0x1c0] sm:$0xf0]  ;;  %v2157_v18 = vld [vmem:[#allocation5 + $0x278] sm:$0xf] }
  0x59   :  { %880 = vmatpush.bf16.msrb.mxu3 %v2154_v50  ;;  %v2194_v50 = vor.u32 %v2692_v43, %v2193_v42  ;;  %v2170_v14 = vor.u32 %v2686_v4, %v2169_v3  ;;  %v1857_v23 = vld [vmem:[#allocation5 + $0x20] sm:$0xf]  ;;  %v2608_v24 = vld [vmem:[#allocation5 + $0x28] sm:$0xf0]  ;;  %v2605_v36 = vld [vmem:[#allocation5 + $0x10] sm:$0xf0] }
  0x5a   :  { %842 = vmatpush.bf16.msrb.mxu0 %v1854_v56  ;;  %v1894_v56 = vor.u32 %v2617_v48, %v1893_v45  ;;  %v1953_v25 = vld [vmem:[#allocation5 + $0xe0] sm:$0xf]  ;;  %v2632_v27 = vld [vmem:[#allocation5 + $0xe8] sm:$0xf0]  ;;  %v1941_v37 = vld [vmem:[#allocation5 + $0xc8] sm:$0xf] }
  0x5b   :  { %855 = vmatpush.bf16.msrb.mxu1 %v1950_v60  ;;  %v1881_v60 = vld [vmem:[#allocation5 + $0x50] sm:$0xf]  ;;  %v2049_v28 = vld [vmem:[#allocation5 + $0x1a0] sm:$0xf]  ;;  %v2656_v29 = vld [vmem:[#allocation5 + $0x1a8] sm:$0xf0] }
  0x5c   :  { %868 = vmatpush.bf16.msrb.mxu2 %v2046_v61  ;;  %v2614_v61 = vld [vmem:[#allocation5 + $0x58] sm:$0xf0]  ;;  %v2145_v30 = vld [vmem:[#allocation5 + $0x260] sm:$0xf]  ;;  %v2680_v31 = vld [vmem:[#allocation5 + $0x268] sm:$0xf0]  ;;  %v2050_v35 = vor.u32 %v2656_v29, %v2049_v28 }
  0x5d   :  { %881 = vmatpush.bf16.msrb.mxu3 %v2142_v1  ;;  %v2073_v1 = vld [vmem:[#allocation5 + $0x1d0] sm:$0xf]  ;;  %v1882_v8 = vor.u32 %v2614_v61, %v1881_v60  ;;  %v2146_v39 = vor.u32 %v2680_v31, %v2145_v30  ;;  %v2037_v40 = vld [vmem:[#allocation5 + $0x188] sm:$0xf]  ;;  %v2653_v41 = vld [vmem:[#allocation5 + $0x190] sm:$0xf0] }
  0x5e   :  { %843 = vmatpush.bf16.msrb.mxu0 %v1842_v11  ;;  %v2074_v10 = vor.u32 %v2662_v2, %v2073_v1  ;;  %v1869_v11 = vld [vmem:[#allocation5 + $0x38] sm:$0xf]  ;;  %v2133_v42 = vld [vmem:[#allocation5 + $0x248] sm:$0xf]  ;;  %v2677_v43 = vld [vmem:[#allocation5 + $0x250] sm:$0xf0] }
  0x5f   :  { %856 = vmatpush.bf16.msrb.mxu1 %v1938_v15  ;;  %v2635_v15 = vld [vmem:[#allocation5 + $0x100] sm:$0xf0]  ;;  %v2721_v45 = vld [vmem:[#allocation8 + $0xb0] sm:$0xf0]  ;;  %v2307_v48 = vld [vmem:[#allocation8 + $0xb4] sm:$0xf0]  ;;  %v2134_v51 = vor.u32 %v2677_v43, %v2133_v42 }
  0x60   :  { %869 = vmatpush.bf16.msrb.mxu2 %v2034_v16  ;;  %v2061_v16 = vld [vmem:[#allocation5 + $0x1b8] sm:$0xf]  ;;  %v2293_v53 = vld [vmem:[#allocation8 + $0x90] sm:$0xf]  ;;  %v2718_v54 = vld [vmem:[#allocation8 + $0x98] sm:$0xf0] }
  0x61   :  { %882 = vmatpush.bf16.msrb.mxu3 %v2130_v19  ;;  %844 = vmatmul.bf16.vlgmr.msrb.gmra.mxu0 %v3102_v5  ;;  %v2683_v19 = vld [vmem:[#allocation5 + $0x280] sm:$0xf0]  ;;  %v2281_v60 = vld [vmem:[#allocation8 + $0x78] sm:$0xf]  ;;  %v2715_v61 = vld [vmem:[#allocation8 + $0x80] sm:$0xf0] }
  0x62   :  { %888 = vmatpush.bf16.msra.mxu0 %v1930_v20  ;;  %857 = vmatmul.bf16.vlgmr.msrb.gmra.mxu1 %v3106_v7  ;;  %v1870_v20 = vor.u32 %v2611_v12, %v1869_v11  ;;  %v2283_v0 = vld [vmem:[#allocation8 + $0x84] sm:$0xf0]  ;;  %v2282_v1 = vor.u32 %v2715_v61, %v2281_v60  ;;  %v2269_v2 = vld [vmem:[#allocation8 + $0x60] sm:$0xf]  ;;  %v2712_v3 = vld [vmem:[#allocation8 + $0x68] sm:$0xf0] }
  0x63   :  { %901 = vmatpush.bf16.msra.mxu1 %v2026_v21  ;;  %870 = vmatmul.bf16.vlgmr.msrb.gmra.mxu2 %v3099_v57  ;;  %v1966_v21 = vor.u32 %v2635_v15, %v1965_v13  ;;  %v2709_v11 = vld [vmem:[#allocation8 + $0x50] sm:$0xf0]  ;;  %v2708_v12 = vld [vmem:[#allocation8 + $0x4c] sm:$0xf]  ;;  %v2702_v28 = vld [vmem:[#allocation8 + $0x1c] sm:$0xf] }
  0x64   :  { %914 = vmatpush.bf16.msra.mxu2 %v2122_v22  ;;  %883 = vmatmul.bf16.vlgmr.msrb.gmra.mxu3 %v3104_v6  ;;  %v2062_v22 = vor.u32 %v2659_v17, %v2061_v16  ;;  %v2705_v16 = vld [vmem:[#allocation8 + $0x34] sm:$0xf]  ;;  %v2247_v17 = vld [vmem:[#allocation8 + $0x3c] sm:$0xf0]  ;;  %v2235_v29 = vld [vmem:[#allocation8 + $0x24] sm:$0xf0] }
  0x65   :  { %927 = vmatpush.bf16.msra.mxu3 %v2218_v26  ;;  %v2158_v26 = vor.u32 %v2683_v19, %v2157_v18  ;;  %v2233_v19 = vld [vmem:[#allocation8 + $0x18] sm:$0xf]  ;;  %v2238_v31 = vor.u32 %v2702_v28, %v2235_v29  ;;  %v2367_v60 = vld [vmem:[#allocation8 + $0x12c] sm:$0xf0] }
  0x66   :  { %889 = vmatpush.bf16.msra.mxu0 %v1918_v32  ;;  %v1858_v32 = vor.u32 %v2608_v24, %v1857_v23  ;;  %v2221_v23 = vld [vmem:[#allocation8] sm:$0xf]  ;;  %v2700_v24 = vld [vmem:[#allocation8 + $0x8] sm:$0xf0]  ;;  %v2361_v29 = vld [vmem:[#allocation8 + $0x110] sm:$0xf] }
  0x67   :  { %902 = vmatpush.bf16.msra.mxu1 %v2014_v33  ;;  %v1845_v33 = vld [vmem:[#allocation5 + $0x8] sm:$0xf] }
  0x68   :  { %915 = vmatpush.bf16.msra.mxu2 %v2110_v34  ;;  %v1954_v34 = vor.u32 %v2632_v27, %v1953_v25  ;;  %v2401_v25 = vld [vmem:[#allocation8 + $0x168] sm:$0xf]  ;;  %v2745_v27 = vld [vmem:[#allocation8 + $0x170] sm:$0xf0] }
  0x69   :  { %928 = vmatpush.bf16.msra.mxu3 %v2206_v38  ;;  %v2629_v38 = vld [vmem:[#allocation5 + $0xd0] sm:$0xf0]  ;;  %v2402_v30 = vor.u32 %v2745_v27, %v2401_v25  ;;  %v2729_v25 = vld [vmem:[#allocation8 + $0xf4] sm:$0xf] }
  0x6a   :  { %890 = vmatpush.bf16.msra.mxu0 %v1906_v44  ;;  %v2305_v44 = vld [vmem:[#allocation8 + $0xa8] sm:$0xf]  ;;  %v1942_v49 = vor.u32 %v2629_v38, %v1941_v37  ;;  %v2699_v37 = vld [vmem:[#allocation8 + $0x4] sm:$0xf] }
  0x6b   :  { %903 = vmatpush.bf16.msra.mxu1 %v2002_v46  ;;  %v1846_v46 = vor.u32 %v2605_v36, %v1845_v33  ;;  %v2306_v52 = vor.u32 %v2721_v45, %v2305_v44  ;;  %v2403_v33 = vld [vmem:[#allocation8 + $0x174] sm:$0xf0]  ;;  %v2742_v36 = vld [vmem:[#allocation8 + $0x158] sm:$0xf0]  ;;  %v2409_v44 = vld [vmem:[#allocation8 + $0x170] sm:$0xf] }
  0x6c   :  { %916 = vmatpush.bf16.msra.mxu2 %v2098_v47  ;;  %v2720_v47 = vld [vmem:[#allocation8 + $0xac] sm:$0xf]  ;;  %v2746_v45 = vld [vmem:[#allocation8 + $0x178] sm:$0xf0] }
  0x6d   :  { %929 = vmatpush.bf16.msra.mxu3 %v2194_v50  ;;  %v2038_v50 = vor.u32 %v2653_v41, %v2037_v40  ;;  %v2310_v55 = vor.u32 %v2720_v47, %v2307_v48  ;;  %v2741_v40 = vld [vmem:[#allocation8 + $0x154] sm:$0xf]  ;;  %v2391_v41 = vld [vmem:[#allocation8 + $0x15c] sm:$0xf0]  ;;  %v2410_v47 = vor.u32 %v2746_v45, %v2409_v44  ;;  %v2739_v48 = vld [vmem:[#allocation8 + $0x140] sm:$0xf0] }
  0x6e   :  { %891 = vmatpush.bf16.msra.mxu0 %v1894_v56  ;;  %v2717_v56 = vld [vmem:[#allocation8 + $0x94] sm:$0xf]  ;;  %v2394_v43 = vor.u32 %v2741_v40, %v2391_v41  ;;  %v2331_v40 = vld [vmem:[#allocation8 + $0xe4] sm:$0xf0]  ;;  %v2349_v45 = vld [vmem:[#allocation8 + $0xf8] sm:$0xf] }
  0x6f   :  { %904 = vmatpush.bf16.msra.mxu1 %v1990_v58  ;;  %v2295_v58 = vld [vmem:[#allocation8 + $0x9c] sm:$0xf0] }
  0x70   :  { %917 = vmatpush.bf16.msra.mxu2 %v2086_v59  ;;  %v2294_v59 = vor.u32 %v2718_v54, %v2293_v53  ;;  %v2298_v62 = vor.u32 %v2717_v56, %v2295_v58  ;;  %v2397_v53 = vld [vmem:[#allocation8 + $0x158] sm:$0xf]  ;;  %v2743_v54 = vld [vmem:[#allocation8 + $0x160] sm:$0xf0]  ;;  %v2736_v58 = vld [vmem:[#allocation8 + $0x128] sm:$0xf0] }
  0x71   :  { %930 = vmatpush.bf16.msra.mxu3 %v2182_v63  ;;  %v2714_v63 = vld [vmem:[#allocation8 + $0x7c] sm:$0xf]  ;;  %v2398_v56 = vor.u32 %v2743_v54, %v2397_v53  ;;  %v2760_v54 = vld [vmem:[#allocation8 + $0x1e8] sm:$0xf0] }
  0x72   :  { %892 = vmatpush.bf16.msra.mxu0 %v1882_v8  ;;  %v2286_v4 = vor.u32 %v2714_v63, %v2283_v0  ;;  %v2711_v8 = vld [vmem:[#allocation8 + $0x64] sm:$0xf]  ;;  %v3119_v63 = vld [vmem:[#allocation7] sm:$0x7]  ;;  %v2385_v0 = vld [vmem:[#allocation8 + $0x140] sm:$0xf] }
  0x73   :  { %905 = vmatpush.bf16.msra.mxu1 %v1978_v9  ;;  %v2270_v9 = vor.u32 %v2712_v3, %v2269_v2  ;;  %v266_v3 = vperm.slane %v3119_v63, 0 }
  0x74   :  { %918 = vmatpush.bf16.msra.mxu2 %v2074_v10  ;;  %v2257_v10 = vld [vmem:[#allocation8 + $0x48] sm:$0xf] }
  0x75   :  { %931 = vmatpush.bf16.msra.mxu3 %v2170_v14  ;;  %v2258_v13 = vor.u32 %v2709_v11, %v2257_v10  ;;  %v2706_v14 = vld [vmem:[#allocation8 + $0x38] sm:$0xf0]  ;;  %v2769_v10 = vld [vmem:[#allocation8 + $0x230] sm:$0xf0]  ;;  %v2732_v11 = vld [vmem:[#allocation8 + $0x10c] sm:$0xf] }
  0x76   :  { %893 = vmatpush.bf16.msra.mxu0 %v1870_v20  ;;  %v2703_v20 = vld [vmem:[#allocation8 + $0x20] sm:$0xf0] }
  0x77   :  { %906 = vmatpush.bf16.msra.mxu1 %v1966_v21  ;;  %v2250_v21 = vor.u32 %v2705_v16, %v2247_v17 }
  0x78   :  { %919 = vmatpush.bf16.msra.mxu2 %v2062_v22  ;;  %v2234_v22 = vor.u32 %v2703_v20, %v2233_v19  ;;  %v2341_v19 = vld [vmem:[#allocation8 + $0xf0] sm:$0xf]  ;;  %v2730_v20 = vld [vmem:[#allocation8 + $0xf8] sm:$0xf0] }
  0x79   :  { %932 = vmatpush.bf16.msra.mxu3 %v2158_v26  ;;  %v2222_v26 = vor.u32 %v2700_v24, %v2221_v23  ;;  %v2342_v23 = vor.u32 %v2730_v20, %v2341_v19  ;;  %v2766_v24 = vld [vmem:[#allocation8 + $0x218] sm:$0xf0] }
  0x7a   :  { %894 = vmatpush.bf16.msra.mxu0 %v1858_v32  ;;  %v2744_v32 = vld [vmem:[#allocation8 + $0x16c] sm:$0xf]  ;;  %v2754_v20 = vld [vmem:[#allocation8 + $0x1b8] sm:$0xf0] }
  0x7b   :  { %907 = vmatpush.bf16.msra.mxu1 %v1954_v34  ;;  %v2406_v34 = vor.u32 %v2744_v32, %v2403_v33  ;;  %v2329_v33 = vld [vmem:[#allocation8 + $0xd8] sm:$0xf] }
  0x7c   :  { %920 = vmatpush.bf16.msra.mxu2 %v2050_v35  ;;  %v2389_v35 = vld [vmem:[#allocation8 + $0x150] sm:$0xf] }
  0x7d   :  { %933 = vmatpush.bf16.msra.mxu3 %v2146_v39  ;;  %v2390_v38 = vor.u32 %v2742_v36, %v2389_v35  ;;  %v2223_v39 = vld [vmem:[#allocation8 + $0xc] sm:$0xf0]  ;;  %v2473_v35 = vld [vmem:[#allocation8 + $0x1f8] sm:$0xf] }
  0x7e   :  { %895 = vmatpush.bf16.msra.mxu0 %v1846_v46  ;;  %v2226_v42 = vor.u32 %v2699_v37, %v2223_v39  ;;  %v2377_v46 = vld [vmem:[#allocation8 + $0x138] sm:$0xf]  ;;  %v2726_v39 = vld [vmem:[#allocation8 + $0xdc] sm:$0xf] }
  0x7f   :  { %908 = vmatpush.bf16.msra.mxu1 %v1942_v49  ;;  %v2738_v49 = vld [vmem:[#allocation8 + $0x13c] sm:$0xf]  ;;  %v2334_v44 = vor.u32 %v2726_v39, %v2331_v40  ;;  %v2748_v39 = vld [vmem:[#allocation8 + $0x188] sm:$0xf0] }
  0x80   :  { %921 = vmatpush.bf16.msra.mxu2 %v2038_v50  ;;  %v2379_v50 = vld [vmem:[#allocation8 + $0x144] sm:$0xf0]  ;;  %v2756_v40 = vld [vmem:[#allocation8 + $0x1cc] sm:$0xf] }
  0x81   :  { %934 = vmatpush.bf16.msra.mxu3 %v2134_v51  ;;  %896 = vmatmul.bf16.vlgmr.msra.gmra.mxu0 %v3102_v5  ;;  %v2271_v5 = vld [vmem:[#allocation8 + $0x6c] sm:$0xf0]  ;;  %v2378_v51 = vor.u32 %v2739_v48, %v2377_v46  ;;  %v2731_v46 = vld [vmem:[#allocation8 + $0x100] sm:$0xf0] }
  0x82   :  { %1434 = vmatpush.bf16.msrb.mxu0 %v2306_v52  ;;  %909 = vmatmul.bf16.vlgmr.msra.gmra.mxu1 %v3106_v7  ;;  %v2274_v7 = vor.u32 %v2711_v8, %v2271_v5  ;;  %v2382_v52 = vor.u32 %v2738_v49, %v2379_v50  ;;  %v2733_v8 = vld [vmem:[#allocation8 + $0x110] sm:$0xf0]  ;;  %v2497_v5 = vld [vmem:[#allocation8 + $0x228] sm:$0xf]  ;;  %v2350_v48 = vor.u32 %v2731_v46, %v2349_v45  ;;  %v2317_v50 = vld [vmem:[#allocation8 + $0xc0] sm:$0xf] }
  0x83   :  { %922 = vmatmul.bf16.vlgmr.msra.gmra.mxu2 %v3099_v57  ;;  %v2259_v57 = vld [vmem:[#allocation8 + $0x54] sm:$0xf0]  ;;  %1447 = vmatpush.bf16.msrb.mxu1 %v2402_v30  ;;  %v2734_v30 = vld [vmem:[#allocation8 + $0x118] sm:$0xf0]  ;;  %v2313_v45 = vld [vmem:[#allocation8 + $0xb0] sm:$0xf] }
  0x84   :  { %935 = vmatmul.bf16.vlgmr.msra.gmra.mxu3 %v3104_v6  ;;  %v2245_v6 = vld [vmem:[#allocation8 + $0x30] sm:$0xf]  ;;  %v2262_v15 = vor.u32 %v2708_v12, %v2259_v57  ;;  %v2498_v57 = vor.u32 %v2769_v10, %v2497_v5  ;;  %v2362_v32 = vor.u32 %v2734_v30, %v2361_v29  ;;  %v2757_v5 = vld [vmem:[#allocation8 + $0x1d0] sm:$0xf0]  ;;  %v2751_v29 = vld [vmem:[#allocation8 + $0x1a0] sm:$0xf0] }
  0x85   :  { %1473 = vmatpush.bf16.msrb.mxu3 %v2310_v55  ;;  %v2246_v18 = vor.u32 %v2706_v14, %v2245_v6  ;;  %v2365_v55 = vld [vmem:[#allocation8 + $0x120] sm:$0xf]  ;;  %v2373_v6 = vld [vmem:[#allocation8 + $0x128] sm:$0xf]  ;;  %v2737_v14 = vld [vmem:[#allocation8 + $0x130] sm:$0xf0] }
  0x86   :  { %1435 = vmatpush.bf16.msrb.mxu0 %v2294_v59  ;;  %v2735_v59 = vld [vmem:[#allocation8 + $0x124] sm:$0xf]  ;;  %v2366_v61 = vor.u32 %v2736_v58, %v2365_v55  ;;  %v2374_v17 = vor.u32 %v2737_v14, %v2373_v6  ;;  %1460 = vmatpush.bf16.msrb.mxu2 %v2498_v57  ;;  %v2725_v57 = vld [vmem:[#allocation8 + $0xd0] sm:$0xf0]  ;;  %v2722_v46 = vld [vmem:[#allocation8 + $0xb8] sm:$0xf0] }
  0x87   :  { %1448 = vmatpush.bf16.msrb.mxu1 %v2390_v38  ;;  %v2763_v38 = vld [vmem:[#allocation8 + $0x200] sm:$0xf0] }
  0x88   :  { %v2723_v55 = vld [vmem:[#allocation8 + $0xc4] sm:$0xf] }
  0x89   :  { %1474 = vmatpush.bf16.msrb.mxu3 %v2298_v62  ;;  %v2370_v62 = vor.u32 %v2735_v59, %v2367_v60  ;;  %v2768_v60 = vld [vmem:[#allocation8 + $0x22c] sm:$0xf] }
  0x8a   :  { %1436 = vmatpush.bf16.msrb.mxu0 %v2282_v1  ;;  %v2740_v1 = vld [vmem:[#allocation8 + $0x148] sm:$0xf0] }
  0x8b   :  { %1449 = vmatpush.bf16.msrb.mxu1 %v2378_v51  ;;  %v2386_v2 = vor.u32 %v2740_v1, %v2385_v0  ;;  %v2724_v51 = vld [vmem:[#allocation8 + $0xc8] sm:$0xf0] }
  0x8c   :  { %v2318_v53 = vor.u32 %v2724_v51, %v2317_v50  ;;  %v2728_v1 = vld [vmem:[#allocation8 + $0xe8] sm:$0xf0]  ;;  %v2314_v50 = vor.u32 %v2722_v46, %v2313_v45  ;;  %v2457_v51 = vld [vmem:[#allocation8 + $0x1d0] sm:$0xf] }
  0x8d   :  { %1475 = vmatpush.bf16.msrb.mxu3 %v2286_v4  ;;  %v2353_v4 = vld [vmem:[#allocation8 + $0x108] sm:$0xf] }
  0x8e   :  { %1437 = vmatpush.bf16.msrb.mxu0 %v2270_v9  ;;  %v2354_v9 = vor.u32 %v2733_v8, %v2353_v4  ;;  %v2449_v8 = vld [vmem:[#allocation8 + $0x1c8] sm:$0xf] }
  0x8f   :  { %1450 = vmatpush.bf16.msrb.mxu1 %v2366_v61  ;;  %v2499_v61 = vld [vmem:[#allocation8 + $0x234] sm:$0xf0] }
  0x90   :  { %v2502_v0 = vor.u32 %v2768_v60, %v2499_v61  ;;  %v2719_v61 = vld [vmem:[#allocation8 + $0xa0] sm:$0xf0] }
  0x91   :  { %1476 = vmatpush.bf16.msrb.mxu3 %v2274_v7  ;;  %v2355_v7 = vld [vmem:[#allocation8 + $0x114] sm:$0xf0] }
  0x92   :  { %1438 = vmatpush.bf16.msrb.mxu0 %v2258_v13  ;;  %v2358_v13 = vor.u32 %v2732_v11, %v2355_v7  ;;  %v2450_v11 = vor.u32 %v2757_v5, %v2449_v8  ;;  %v2487_v7 = vld [vmem:[#allocation8 + $0x21c] sm:$0xf0]  ;;  %v2750_v5 = vld [vmem:[#allocation8 + $0x19c] sm:$0xf] }
  0x93   :  { %1451 = vmatpush.bf16.msrb.mxu1 %v2354_v9  ;;  %v2765_v9 = vld [vmem:[#allocation8 + $0x214] sm:$0xf] }
  0x94   :  { %v2490_v14 = vor.u32 %v2765_v9, %v2487_v7  ;;  %v2427_v9 = vld [vmem:[#allocation8 + $0x1a4] sm:$0xf0] }
  0x95   :  { %1477 = vmatpush.bf16.msrb.mxu3 %v2262_v15 }
  0x96   :  { %1439 = vmatpush.bf16.msrb.mxu0 %v2246_v18 }
  0x97   :  { %1452 = vmatpush.bf16.msrb.mxu1 %v2342_v23 }
  0x99   :  { %1478 = vmatpush.bf16.msrb.mxu3 %v2250_v21  ;;  %v2485_v21 = vld [vmem:[#allocation8 + $0x210] sm:$0xf] }
  0x9a   :  { %1440 = vmatpush.bf16.msrb.mxu0 %v2234_v22  ;;  %v2486_v27 = vor.u32 %v2766_v24, %v2485_v21  ;;  %v2762_v21 = vld [vmem:[#allocation8 + $0x1fc] sm:$0xf] }
  0x9c   :  { %1461 = vmatpush.bf16.msrb.mxu2 %v2486_v27  ;;  %v2764_v27 = vld [vmem:[#allocation8 + $0x208] sm:$0xf0] }
  0x9d   :  { %1479 = vmatpush.bf16.msrb.mxu3 %v2238_v31 }
  0x9e   :  { %1441 = vmatpush.bf16.msrb.mxu0 %v2222_v26  ;;  %v2343_v26 = vld [vmem:[#allocation8 + $0xfc] sm:$0xf0] }
  0x9f   :  { %v2346_v28 = vor.u32 %v2729_v25, %v2343_v26  ;;  %v2481_v26 = vld [vmem:[#allocation8 + $0x200] sm:$0xf] }
  0xa1   :  { %1480 = vmatpush.bf16.msrb.mxu3 %v2226_v42 }
  0xa2   :  { %1486 = vmatpush.bf16.msra.mxu0 %v2406_v34  ;;  %v2727_v34 = vld [vmem:[#allocation8 + $0xe0] sm:$0xf0] }
  0xa3   :  { %v2330_v37 = vor.u32 %v2727_v34, %v2329_v33  ;;  %v267_v33 = vperm.slane %v3119_v63, 1  ;;  %v2482_v34 = vor.u32 %v2764_v27, %v2481_v26  ;;  %v2749_v26 = vld [vmem:[#allocation8 + $0x190] sm:$0xf0] }
  0xa5   :  { %1525 = vmatpush.bf16.msra.mxu3 %v2410_v47  ;;  %1453 = vmatpush.bf16.msrb.mxu1 %v2330_v37  ;;  %v2761_v37 = vld [vmem:[#allocation8 + $0x1f0] sm:$0xf0] }
  0xa6   :  { %1487 = vmatpush.bf16.msra.mxu0 %v2394_v43  ;;  %v2474_v43 = vor.u32 %v2763_v38, %v2473_v35  ;;  %v2413_v38 = vld [vmem:[#allocation8 + $0x180] sm:$0xf] }
  0xa8   :  { %1462 = vmatpush.bf16.msrb.mxu2 %v2474_v43  ;;  %v2414_v43 = vor.u32 %v2748_v39, %v2413_v38  ;;  %v268_v39 = vperm.slane %v3119_v63, 2 }
  0xa9   :  { %1526 = vmatpush.bf16.msra.mxu3 %v2398_v56  ;;  %v2319_v56 = vld [vmem:[#allocation8 + $0xcc] sm:$0xf0]  ;;  %1454 = vmatpush.bf16.msrb.mxu1 %v2318_v53 }
  0xaa   :  { %1488 = vmatpush.bf16.msra.mxu0 %v2382_v52  ;;  %v2461_v52 = vld [vmem:[#allocation8 + $0x1e0] sm:$0xf]  ;;  %v2322_v59 = vor.u32 %v2723_v55, %v2319_v56  ;;  %v2301_v56 = vld [vmem:[#allocation8 + $0x98] sm:$0xf] }
  0xab   :  { %v2462_v58 = vor.u32 %v2760_v54, %v2461_v52  ;;  %v2758_v52 = vld [vmem:[#allocation8 + $0x1d8] sm:$0xf0]  ;;  %v2753_v54 = vld [vmem:[#allocation8 + $0x1b4] sm:$0xf]  ;;  %v2439_v55 = vld [vmem:[#allocation8 + $0x1bc] sm:$0xf0] }
  0xac   :  { %v2442_v60 = vor.u32 %v2753_v54, %v2439_v55 }
  0xad   :  { %1527 = vmatpush.bf16.msra.mxu3 %v2386_v2  ;;  %v2505_v2 = vld [vmem:[#allocation8 + $0x230] sm:$0xf]  ;;  %1463 = vmatpush.bf16.msrb.mxu2 %v2462_v58 }
  0xae   :  { %1489 = vmatpush.bf16.msra.mxu0 %v2370_v62  ;;  %v2337_v62 = vld [vmem:[#allocation8 + $0xe0] sm:$0xf]  ;;  %1499 = vmatpush.bf16.msra.mxu1 %v2502_v0 }
  0xaf   :  { %v2338_v4 = vor.u32 %v2728_v1, %v2337_v62  ;;  %v2302_v1 = vor.u32 %v2719_v61, %v2301_v56  ;;  %v2786_v56 = vld [vmem:[#allocation11 + $0x78] sm:$0xff]  ;;  %v2784_v61 = vld [vmem:[#allocation11 + $0x68] sm:$0xff] }
  0xb1   :  { %1528 = vmatpush.bf16.msra.mxu3 %v2374_v17  ;;  %v2437_v17 = vld [vmem:[#allocation8 + $0x1b0] sm:$0xf]  ;;  %1464 = vmatpush.bf16.msrb.mxu2 %v2450_v11 }
  0xb2   :  { %1490 = vmatpush.bf16.msra.mxu0 %v2358_v13  ;;  %v2438_v23 = vor.u32 %v2754_v20, %v2437_v17  ;;  %1500 = vmatpush.bf16.msra.mxu1 %v2490_v14  ;;  %v2752_v14 = vld [vmem:[#allocation8 + $0x1a8] sm:$0xf0]  ;;  %v2277_v17 = vld [vmem:[#allocation8 + $0x68] sm:$0xf] }
  0xb5   :  { %1529 = vmatpush.bf16.msra.mxu3 %v2362_v32  ;;  %1465 = vmatpush.bf16.msrb.mxu2 %v2438_v23  ;;  %v2463_v32 = vld [vmem:[#allocation8 + $0x1ec] sm:$0xf0] }
  0xb6   :  { %1491 = vmatpush.bf16.msra.mxu0 %v2346_v28  ;;  %v2425_v28 = vld [vmem:[#allocation8 + $0x198] sm:$0xf] }
  0xb7   :  { %v2426_v30 = vor.u32 %v2751_v29, %v2425_v28  ;;  %v2265_v28 = vld [vmem:[#allocation8 + $0x50] sm:$0xf]  ;;  %v2710_v29 = vld [vmem:[#allocation8 + $0x58] sm:$0xf0] }
  0xb9   :  { %1530 = vmatpush.bf16.msra.mxu3 %v2350_v48  ;;  %1466 = vmatpush.bf16.msrb.mxu2 %v2426_v30 }
  0xba   :  { %1492 = vmatpush.bf16.msra.mxu0 %v2334_v44  ;;  %v2451_v44 = vld [vmem:[#allocation8 + $0x1d4] sm:$0xf0] }
  0xbd   :  { %1531 = vmatpush.bf16.msra.mxu3 %v2338_v4  ;;  %1467 = vmatpush.bf16.msrb.mxu2 %v2414_v43 }
  0xbe   :  { %v793_v12 = vpop.f32.mrf.mxu0  ;;  %1493 = vmatpush.bf16.msra.mxu0 %v2322_v59  ;;  %v2458_v59 = vor.u32 %v2758_v52, %v2457_v51 }
  0xbf   :  { %v794_v15 = vadd.f32 %v793_v12, %v266_v3  ;;  %v806_v16 = vpop.f32.mrf.mxu1  ;;  %v2770_v3 = vld [vmem:[#allocation8 + $0x238] sm:$0xf0]  ;;  %v2325_v12 = vld [vmem:[#allocation8 + $0xc8] sm:$0xf] }
  0xc0   :  { %v2506_v6 = vor.u32 %v2770_v3, %v2505_v2  ;;  %v2326_v19 = vor.u32 %v2725_v57, %v2325_v12  ;;  %v2445_v2 = vld [vmem:[#allocation8 + $0x1b8] sm:$0xf]  ;;  %v2755_v3 = vld [vmem:[#allocation8 + $0x1c0] sm:$0xf0]  ;;  %v2430_v12 = vor.u32 %v2750_v5, %v2427_v9  ;;  %v2716_v57 = vld [vmem:[#allocation8 + $0x88] sm:$0xf0] }
  0xc1   :  { %v807_v22 = vadd.f32 %v806_v16, %v794_v15  ;;  %v2493_v15 = vld [vmem:[#allocation8 + $0x218] sm:$0xf]  ;;  %v2767_v16 = vld [vmem:[#allocation8 + $0x220] sm:$0xf0]  ;;  %1512 = vmatpush.bf16.msra.mxu2 %v2314_v50  ;;  %v2446_v7 = vor.u32 %v2755_v3, %v2445_v2  ;;  %v2776_v3 = vld [vmem:[#allocation11 + $0x28] sm:$0xff] }
  0xc2   :  { %v2494_v24 = vor.u32 %v2767_v16, %v2493_v15  ;;  %1532 = vmatpush.bf16.msra.mxu3 %v2326_v19  ;;  %v2747_v15 = vld [vmem:[#allocation8 + $0x184] sm:$0xf]  ;;  %v2415_v16 = vld [vmem:[#allocation8 + $0x18c] sm:$0xf0]  ;;  %v2781_v5 = vld [vmem:[#allocation11 + $0x50] sm:$0xff] }
  0xc3   :  { %v2783_v2 = vld [vmem:[#allocation11 + $0x60] sm:$0xff] }
  0xc5   :  { %1513 = vmatpush.bf16.msra.mxu2 %v2302_v1  ;;  %v2777_v1 = vld [vmem:[#allocation11 + $0x30] sm:$0xff] }
  0xc6   :  { %v819_v18 = vpop.f32.mrf.mxu2  ;;  %v795_v42 = vpop.f32.mrf.mxu0 }
  0xc7   :  { %v820_v31 = vadd.f32 %v819_v18, %v807_v22  ;;  %v832_v36 = vpop.f32.mrf.mxu3  ;;  %v808_v47 = vpop.f32.mrf.mxu1  ;;  %v2475_v22 = vld [vmem:[#allocation8 + $0x204] sm:$0xf0] }
  0xc8   :  { %v2478_v25 = vor.u32 %v2762_v21, %v2475_v22  ;;  %v2418_v21 = vor.u32 %v2747_v15, %v2415_v16  ;;  %v2713_v22 = vld [vmem:[#allocation8 + $0x70] sm:$0xf0]  ;;  %v2772_v16 = vld [vmem:[#allocation11 + $0x8] sm:$0xff] }
  0xc9   :  { %v833_v41 = vadd.f32 %v832_v36, %v820_v31  ;;  %v2759_v31 = vld [vmem:[#allocation8 + $0x1e4] sm:$0xf]  ;;  %v2469_v36 = vld [vmem:[#allocation8 + $0x1e8] sm:$0xf] }
  0xca   :  { %1501 = vmatpush.bf16.msra.mxu1 %v2478_v25  ;;  %v2466_v35 = vor.u32 %v2759_v31, %v2463_v32  ;;  %v2470_v42 = vor.u32 %v2761_v37, %v2469_v36  ;;  %v2421_v25 = vld [vmem:[#allocation8 + $0x188] sm:$0xf]  ;;  %v2266_v32 = vor.u32 %v2710_v29, %v2265_v28  ;;  %v2241_v36 = vld [vmem:[#allocation8 + $0x20] sm:$0xf]  ;;  %v2704_v37 = vld [vmem:[#allocation8 + $0x28] sm:$0xf0] }
  0xcb   :  { %2808 = vtanh.f32 %v833_v41  ;;  %v2422_v31 = vor.u32 %v2749_v26, %v2421_v25  ;;  %v2242_v38 = vor.u32 %v2704_v37, %v2241_v36  ;;  %v2789_v26 = vld [vmem:[#allocation11 + $0x90] sm:$0xff]  ;;  %v2788_v29 = vld [vmem:[#allocation11 + $0x88] sm:$0xff] }
  0xce   :  { %v821_v49 = vpop.f32.mrf.mxu2  ;;  %1502 = vmatpush.bf16.msra.mxu1 %v2466_v35 }
  0xcf   :  { %v834_v10 = vpop.f32.mrf.mxu3  ;;  %v2454_v49 = vor.u32 %v2756_v40, %v2451_v44  ;;  %v2229_v40 = vld [vmem:[#allocation8 + $0x8] sm:$0xf] }
  0xd0   :  { %v2289_v10 = vld [vmem:[#allocation8 + $0x80] sm:$0xf] }
  0xd1   :  { %v2809_v13 = vpop.eup %2808 }
  0xd2   :  { %v3122_v18 = vpack.c.bf16 %v2809_v13, %v2809_v13  ;;  %1503 = vmatpush.bf16.msra.mxu1 %v2454_v49  ;;  %v2290_v13 = vor.u32 %v2716_v57, %v2289_v10  ;;  %v2794_v57 = vld [vmem:[#allocation11 + $0xb8] sm:$0xff] }
  0xd4   :  { %1442 = vmatmul.bf16.vlgmr.msrb.gmra.mxu0 %v3122_v18  ;;  %1481 = vmatmul.bf16.vlgmr.msrb.gmra.mxu3 %v3122_v18 }
  0xd5   :  { %1538 = vmatpush.bf16.msrb.mxu0 %v2506_v6  ;;  %v2433_v6 = vld [vmem:[#allocation8 + $0x1a0] sm:$0xf]  ;;  %1514 = vmatpush.bf16.msra.mxu2 %v2290_v13  ;;  %v2779_v13 = vld [vmem:[#allocation11 + $0x40] sm:$0xff] }
  0xd6   :  { %1504 = vmatpush.bf16.msra.mxu1 %v2442_v60  ;;  %v2434_v20 = vor.u32 %v2752_v14, %v2433_v6  ;;  %v2778_v60 = vld [vmem:[#allocation11 + $0x38] sm:$0xff]  ;;  %1779 = vmatpush.bf16.msrb.mxu3 %v2794_v57 }
  0xd9   :  { %1539 = vmatpush.bf16.msrb.mxu0 %v2494_v24  ;;  %v2278_v24 = vor.u32 %v2713_v22, %v2277_v17  ;;  %v2793_v17 = vld [vmem:[#allocation11 + $0xb0] sm:$0xff]  ;;  %v2791_v22 = vld [vmem:[#allocation11 + $0xa0] sm:$0xff] }
  0xda   :  { %1505 = vmatpush.bf16.msra.mxu1 %v2430_v12  ;;  %v2773_v12 = vld [vmem:[#allocation11 + $0x10] sm:$0xff]  ;;  %1780 = vmatpush.bf16.msrb.mxu3 %v2793_v17 }
  0xdb   :  { %1515 = vmatpush.bf16.msra.mxu2 %v2278_v24  ;;  %v2790_v24 = vld [vmem:[#allocation11 + $0x98] sm:$0xff] }
  0xdd   :  { %1540 = vmatpush.bf16.msrb.mxu0 %v2482_v34  ;;  %v2707_v34 = vld [vmem:[#allocation8 + $0x40] sm:$0xf0] }
  0xde   :  { %v845_v41 = vpop.f32.mrf.mxu0  ;;  %1506 = vmatpush.bf16.msra.mxu1 %v2418_v21 }
  0xdf   :  { %v846_v47 = vadd.f32 %v845_v41, %v267_v33  ;;  %v858_v48 = vpop.f32.mrf.mxu1  ;;  %v2253_v33 = vld [vmem:[#allocation8 + $0x38] sm:$0xf]  ;;  %1516 = vmatpush.bf16.msra.mxu2 %v2266_v32  ;;  %v2701_v41 = vld [vmem:[#allocation8 + $0x10] sm:$0xf0] }
  0xe0   :  { %v2254_v35 = vor.u32 %v2707_v34, %v2253_v33  ;;  %v2230_v43 = vor.u32 %v2701_v41, %v2229_v40 }
  0xe1   :  { %v859_v53 = vadd.f32 %v858_v48, %v846_v47  ;;  %1541 = vmatpush.bf16.msrb.mxu0 %v2470_v42 }
  0xe3   :  { %1517 = vmatpush.bf16.msra.mxu2 %v2254_v35  ;;  %v2787_v35 = vld [vmem:[#allocation11 + $0x80] sm:$0xff] }
  0xe5   :  { %1542 = vmatpush.bf16.msrb.mxu0 %v2458_v59  ;;  %v2785_v59 = vld [vmem:[#allocation11 + $0x70] sm:$0xff] }
  0xe6   :  { %v871_v58 = vpop.f32.mrf.mxu2  ;;  %v847_v8 = vpop.f32.mrf.mxu0 }
  0xe7   :  { %v872_v62 = vadd.f32 %v871_v58, %v859_v53  ;;  %v884_v0 = vpop.f32.mrf.mxu3  ;;  %v860_v11 = vpop.f32.mrf.mxu1  ;;  %1518 = vmatpush.bf16.msra.mxu2 %v2242_v38 }
  0xe8   :  { %v2774_v11 = vld [vmem:[#allocation11 + $0x18] sm:$0xff] }
  0xe9   :  { %v885_v4 = vadd.f32 %v884_v0, %v872_v62  ;;  %1543 = vmatpush.bf16.msrb.mxu0 %v2446_v7  ;;  %v2780_v7 = vld [vmem:[#allocation11 + $0x48] sm:$0xff] }
  0xeb   :  { %2810 = vtanh.f32 %v885_v4  ;;  %1519 = vmatpush.bf16.msra.mxu2 %v2230_v43  ;;  %v2782_v4 = vld [vmem:[#allocation11 + $0x58] sm:$0xff] }
  0xed   :  { %1544 = vmatpush.bf16.msrb.mxu0 %v2434_v20  ;;  %v2792_v20 = vld [vmem:[#allocation11 + $0xa8] sm:$0xff] }
  0xee   :  { %v873_v19 = vpop.f32.mrf.mxu2  ;;  %1781 = vmatpush.bf16.msrb.mxu3 %v2792_v20 }
  0xef   :  { %v886_v23 = vpop.f32.mrf.mxu3  ;;  %v2771_v19 = vld [vmem:[#allocation11] sm:$0xff] }
  0xf0   :  { %v1042_v23 = vld [vmem:[#allocation10] sm:$0x7] }
  0xf1   :  { %v2811_v27 = vpop.eup %2810  ;;  %1545 = vmatpush.bf16.msrb.mxu0 %v2422_v31  ;;  %v1045_v25 = vperm.slane %v1042_v23, 1  ;;  %v1044_v28 = vperm.slane %v1042_v23, 0 }
  0xf2   :  { %v944_v30 = vpack.c.bf16 %v2811_v27, %v2811_v27  ;;  %1782 = vmatpush.bf16.msrb.mxu3 %v2791_v22 }
  0xf4   :  { %1455 = vmatmul.bf16.vlgmr.msrb.gmra.mxu1 %v944_v30  ;;  %1494 = vmatmul.bf16.vlgmr.msra.gmra.mxu0 %v944_v30 }
  0xf5   :  { %1533 = vmatmul.bf16.vlgmr.msra.gmra.mxu3 %v944_v30  ;;  %1753 = vmatpush.bf16.msrb.mxu1 %v2778_v60 }
  0xf6   :  { %1783 = vmatpush.bf16.msrb.mxu3 %v2790_v24 }
  0xf9   :  { %1754 = vmatpush.bf16.msrb.mxu1 %v2777_v1 }
  0xfa   :  { %1784 = vmatpush.bf16.msrb.mxu3 %v2789_v26 }
  0xfd   :  { %1755 = vmatpush.bf16.msrb.mxu1 %v2776_v3 }
  0xfe   :  { %v897_v42 = vpop.f32.mrf.mxu0  ;;  %1785 = vmatpush.bf16.msrb.mxu3 %v2788_v29 }
  0xff   :  { %v898_v44 = vadd.f32 %v897_v42, %v268_v39  ;;  %v910_v45 = vpop.f32.mrf.mxu1 }
 0x101   :  { %v911_v46 = vadd.f32 %v910_v45, %v898_v44 }
 0x102   :  { %1786 = vmatpush.bf16.msrb.mxu3 %v2787_v35 }
 0x106   :  { %v923_v47 = vpop.f32.mrf.mxu2  ;;  %v899_v50 = vpop.f32.mrf.mxu0 }
 0x107   :  { %v924_v48 = vadd.f32 %v923_v47, %v911_v46  ;;  %v936_v49 = vpop.f32.mrf.mxu3  ;;  %v912_v51 = vpop.f32.mrf.mxu1  ;;  %v1046_v46 = vperm.slane %v1042_v23, 2 }
 0x109   :  { %v937_v52 = vadd.f32 %v936_v49, %v924_v48 }
 0x10b   :  { %2812 = vtanh.f32 %v937_v52 }
 0x10e   :  { %v925_v53 = vpop.f32.mrf.mxu2 }
 0x10f   :  { %v938_v54 = vpop.f32.mrf.mxu3 }
 0x111   :  { %v2813_v55 = vpop.eup %2812 }
 0x112   :  { %v945_v63 = vpack.c.bf16 %v2813_v55, %v2813_v55 }
 0x114   :  { %1468 = vmatmul.bf16.vlgmr.msrb.gmra.mxu2 %v945_v63  ;;  %1507 = vmatmul.bf16.vlgmr.msra.gmra.mxu1 %v945_v63 }
 0x115   :  { %1546 = vmatmul.bf16.vlgmr.msrb.gmra.mxu0 %v945_v63  ;;  %1766 = vmatpush.bf16.msrb.mxu2 %v2786_v56 }
 0x119   :  { %1767 = vmatpush.bf16.msrb.mxu2 %v2785_v59 }
 0x11d   :  { %1768 = vmatpush.bf16.msrb.mxu2 %v2784_v61 }
 0x121   :  { %1769 = vmatpush.bf16.msrb.mxu2 %v2783_v2 }
 0x124   :  { %1520 = vmatmul.bf16.vlgmr.msra.gmra.mxu2 %v3122_v18  ;;  %v2775_v18 = vld [vmem:[#allocation11 + $0x20] sm:$0xff] }
 0x125   :  { %1770 = vmatpush.bf16.msrb.mxu2 %v2782_v4  ;;  %1756 = vmatpush.bf16.msrb.mxu1 %v2775_v18 }
 0x129   :  { %1771 = vmatpush.bf16.msrb.mxu2 %v2781_v5  ;;  %1757 = vmatpush.bf16.msrb.mxu1 %v2774_v11 }
 0x12d   :  { %1772 = vmatpush.bf16.msrb.mxu2 %v2780_v7  ;;  %1758 = vmatpush.bf16.msrb.mxu1 %v2773_v12 }
 0x131   :  { %1773 = vmatpush.bf16.msrb.mxu2 %v2779_v13  ;;  %1759 = vmatpush.bf16.msrb.mxu1 %v2772_v16 }
 0x135   :  { %1760 = vmatpush.bf16.msrb.mxu1 %v2771_v19 }
 0x151   :  { %v1443_v58 = vpop.f32.mrf.mxu0 }
 0x152   :  { %v1444_v32 = vadd.f32 %v1443_v58, %v1044_v28  ;;  %v2807_v58 = vld [vmem:[#allocation13] ss:$0 sm:$0xff] }
 0x157   :  { %v1482_v62 = vpop.f32.mrf.mxu3 }
 0x158   :  { %v1483_v27 = vadd.f32 %v1482_v62, %v1045_v25 }
 0x159   :  { %v1445_v0 = vpop.f32.mrf.mxu0 }
 0x15f   :  { %v1484_v8 = vpop.f32.mrf.mxu3 }
 0x171   :  { %v1456_v9 = vpop.f32.mrf.mxu1  ;;  %v1495_v10 = vpop.f32.mrf.mxu0 }
 0x172   :  { %v1496_v30 = vadd.f32 %v1495_v10, %v1483_v27  ;;  %v1457_v36 = vadd.f32 %v1456_v9, %v1444_v32 }
 0x178   :  { %v1534_v6 = vpop.f32.mrf.mxu3 }
 0x179   :  { %v1458_v14 = vpop.f32.mrf.mxu1  ;;  %v1497_v15 = vpop.f32.mrf.mxu0 }
 0x180   :  { %v1536_v21 = vpop.f32.mrf.mxu3 }
 0x191   :  { %v1508_v31 = vpop.f32.mrf.mxu1 }
 0x192   :  { %v1509_v33 = vadd.f32 %v1508_v31, %v1496_v30  ;;  %v1547_v34 = vpop.f32.mrf.mxu0 }
 0x194   :  { %2814 = vtanh.f32 %v1509_v33 }
 0x197   :  { %v1469_v37 = vpop.f32.mrf.mxu2 }
 0x198   :  { %v1470_v38 = vadd.f32 %v1469_v37, %v1457_v36 }
 0x199   :  { %v1510_v39 = vpop.f32.mrf.mxu1 }
 0x19a   :  { %v2815_v40 = vpop.eup %2814  ;;  %2816 = vtanh.f32 %v1470_v38  ;;  %v1549_v41 = vpop.f32.mrf.mxu0 }
 0x19b   :  { %v1555_v42 = vpack.c.bf16 %v2815_v40, %v2815_v40 }
 0x19d   :  { %1774 = vmatmul.bf16.vlgmr.msrb.gmra.mxu2 %v1555_v42 }
 0x19f   :  { %v1471_v43 = vpop.f32.mrf.mxu2 }
 0x1a0   :  { %v2817_v44 = vpop.eup %2816 }
 0x1a1   :  { %v1554_v45 = vpack.c.bf16 %v2817_v44, %v2817_v44 }
 0x1a3   :  { %1761 = vmatmul.bf16.vlgmr.msrb.gmra.mxu1 %v1554_v45 }
 0x1a7   :  { %v1521_v47 = vpop.f32.mrf.mxu2 }
 0x1a8   :  { %v1522_v48 = vadd.f32 %v1521_v47, %v1046_v46 }
 0x1aa   :  { %v1535_v49 = vadd.f32 %v1534_v6, %v1522_v48 }
 0x1ac   :  { %v1548_v50 = vadd.f32 %v1547_v34, %v1535_v49 }
 0x1ae   :  { %2818 = vtanh.f32 %v1548_v50 }
 0x1af   :  { %v1523_v51 = vpop.f32.mrf.mxu2 }
 0x1b4   :  { %v2819_v52 = vpop.eup %2818 }
 0x1b5   :  { %v1556_v53 = vpack.c.bf16 %v2819_v52, %v2819_v52 }
 0x1b7   :  { %1787 = vmatmul.bf16.vlgmr.msrb.gmra.mxu3 %v1556_v53 }
 0x220   :  { %v1762_v54 = vpop.f32.mrf.mxu1  ;;  %v1775_v55 = vpop.f32.mrf.mxu2 }
 0x221   :  { %v1763_v59 = vadd.f32 %v2807_v58, %v1762_v54 }
 0x223   :  { %v1776_v60 = vadd.f32 %v1775_v55, %v1763_v59 }
 0x228   :  { %v1764_v63 = vpop.f32.mrf.mxu1  ;;  %v1777_v56 = vpop.f32.mrf.mxu2 }
 0x23a   :  { %v1788_v61 = vpop.f32.mrf.mxu3 }
 0x23b   :  { %v1789_v62 = vadd.f32 %v1788_v61, %v1776_v60 }
 0x23d   :  { %1792 = vmax.xlane.f32.xlu0 %v1789_v62 }
 0x242   :  { %v1790_v0 = vpop.f32.mrf.mxu3 }
 0x2b0   :  { %v1793_v1 = vpop.xlane.xlu0 %1792 }
 0x2b1   :  { %v1794_v2 = vsub.f32 %v1789_v62, %v1793_v1 }
 0x2b3   :  { %v1795_v3 = vmul.f32 1.442695, %v1794_v2 }
 0x2b5   :  { %2820 = vpow2.f32 %v1795_v3 }
 0x2bb   :  { %v2821_v4 = vpop.eup %2820 }
 0x2bc   :  { %1797 = vadd.xlane.f32.xlu0 %v2821_v4 }
 0x32f   :  { %v1798_v8 = vpop.xlane.xlu0 %1797 }
 0x330   :  { %2822 = vrcp.f32 %v1798_v8  ;;  %v1810_v10 = vand.u32 2147483648, %v1798_v8  ;;  %v1808_v7 = vand.u32 2147483647, %v1798_v8  ;;  %vm1804_vm1 = vweird.f32 %v1798_v8 }
 0x332   :  { %v1811_v57 = vor.u32 1.1754944e-38, %v1810_v10  ;;  %vm1809_vm3 = vcmp.eq.f32.partialorder %v1808_v7, 8.507059e+37 }
 0x336   :  { %v2823_v18 = vpop.eup %2822 }
 0x337   :  { %v1800_v5 = vmul.f32 %v2823_v18, %v1798_v8  ;;  %vm1805_vm0 = vweird.f32 %v2823_v18 }
 0x338   :  { %vm1806_vm2 = vmor %vm1804_vm1, %vm1805_vm0 }
 0x339   :  { %v1801_v9 = vsub.f32 1.0, %v1800_v5 }
 0x33b   :  { %v1802_v11 = vmul.f32 %v2823_v18, %v1801_v9 }
 0x33d   :  { %v1803_v12 = vadd.f32 %v2823_v18, %v1802_v11 }
 0x33f   :  { %v1807_v13 = vsel %vm1806_vm2, %v2823_v18, %v1803_v12 }
 0x340   :  { %v1812_v6 = vsel %vm1809_vm3, %v1811_v57, %v1807_v13 }
 0x341   :  { %v1813_v14 = vmul.f32 %v2821_v4, %v1812_v6 }
 0x343   :  { %1814 = vst [vmem:[#allocation14] sm:$0xff] %v1813_v14 }
 0x344   :  { %1825 = dma.vmem_to_hbm [thread:$0]  %s1821_s6, 128, %s1823_s14, [#allocation4]  }
 0x345   :  { %3024 = dma.done.wait [#allocation4], 128  }
 0x346   :  { %3025 = vsyncadd [#allocation4], 4294967168 }
 0x347   :  { %1830 = vsyncpa [#allocation3], 1 }
 0x348   :  { %1831 = vsyncpa [#allocation6], 1 }
 0x349   :  { %1832 = vsyncpa [#allocation9], 1 }
 0x34a   :  { %1833 = vsyncpa [#allocation12], 1 }
 0x34b   :  { %1834 = vsyncpa [#allocation4], 1 }

</bundles_post_ra>
